<compile_context>
chip_gen: v6e
topology: v6e:2x2x1
jax: 0.10.0
libtpu: 0.0.40
codegen_flags: <defaults>
</compile_context>

<pallas_src>
import functools
import math

import jax
import jax.numpy as jnp
from jax.experimental import pallas as pl
from jax.experimental.pallas import tpu as pltpu

LOG_THETA = 9.210340371976184  # matches the PyTorch module


# ----------------------------- plain-JAX helpers -----------------------------

def _freq_embed(timestep, freq_dim, dtype):
    """Sinusoidal frequency embedding, computed in f32 then cast (as in PyTorch)."""
    half = freq_dim // 2
    freq = jnp.exp(jnp.arange(half, dtype=jnp.float32) * (-LOG_THETA / half))
    emb = timestep.astype(jnp.float32).reshape(-1, 1) * freq[None, :]
    return jnp.concatenate([jnp.cos(emb), jnp.sin(emb)], axis=-1).astype(dtype)


def _projector(x, w1, b1, w2, b2):
    """fc2(SiLU(fc1(x))): f32 MXU accumulation, bias-add + SiLU in the weight dtype."""
    h = jnp.dot(x.astype(w1.dtype), w1, preferred_element_type=jnp.float32)
    h = h.astype(w1.dtype) + b1
    h = h * jax.nn.sigmoid(h)
    y = jnp.dot(h.astype(w2.dtype), w2, preferred_element_type=jnp.float32)
    return y + b2.astype(jnp.float32)                       # (rows, E) in f32


# --------------------------------- kernel ------------------------------------

def _cond_embed_kernel(z_ref,                     # (TILE_N, C)   z tile (leading dim squeezed)
                       cw1_ref, cb1_ref, cw2_ref, # resident condition-proj weights
                       tcb2_ref,                  # (1, E) f32: t + c_b2 for this batch element
                       out_ref):                  # (TILE_N, E)
    w_dtype = cw1_ref.dtype

    z = z_ref[...].astype(w_dtype)                                    # (TILE_N, C)
    h = jnp.dot(z, cw1_ref[...], preferred_element_type=jnp.float32)  # MXU, f32 acc
    h = h.astype(w_dtype) + cb1_ref[...]                              # bias add in weight dtype
    h = h * jax.nn.sigmoid(h)                                         # SiLU in weight dtype
    c = jnp.dot(h, cw2_ref[...], preferred_element_type=jnp.float32)  # MXU, f32 acc

    # single fused epilogue: + (timestep embedding + fc2 bias), broadcast over TILE_N rows
    out_ref[...] = (c + tcb2_ref[...]).astype(out_ref.dtype)


# --------------------------------- wrapper ------------------------------------

def time_cond_embed(timestep, z, params, freq_dim=256, tile_n=512):
    """timestep: (B,), z: (B, N, cond_dim).  Returns (B, N, embed_dim) in z.dtype."""
    B, N, C = z.shape
    E = params["c_w2"].shape[1]

    # Pick the largest tile <= tile_n that divides N (keep sublane-aligned).
    tile_n = min(tile_n, N)
    while N % tile_n:
        tile_n //= 2
    if tile_n != N and tile_n % 8:
        tile_n = N  # fall back to a single full-length tile

    # ---- timestep branch hoisted out of the kernel (tiny (B, E) op, M=1 matmuls) ----
    fe = _freq_embed(timestep, freq_dim, params["t_w1"].dtype)
    t = _projector(fe, params["t_w1"], params["t_b1"], params["t_w2"], params["t_b2"])
    # Fold the condition fc2 bias in -> single broadcast-add per tile inside the kernel.
    t_plus_b2 = (t + params["c_b2"].astype(jnp.float32)).reshape(B, 1, E)

    w_size = jnp.dtype(params["c_w1"].dtype).itemsize
    z_size = jnp.dtype(z.dtype).itemsize

    # VMEM budget: double-buffered z/out tiles + resident weights + intermediates.
    weight_bytes = (C * E + E * E + E) * w_size
    io_tile_bytes = tile_n * (C + E) * z_size + E * 4
    interm_bytes = tile_n * E * (w_size + 4)
    vmem_est = 2 * (io_tile_bytes + weight_bytes) + interm_bytes
    # Cap below v7x's 64 MiB physical VMEM; demo shapes are far under the 32 MiB floor.
    vmem_limit = int(min(max(vmem_est + (8 << 20), 32 << 20), 48 << 20))

    flops = 2 * B * N * (C * E + E * E)
    transcendentals = B * N * E
    bytes_accessed = B * N * (C + E) * z_size + weight_bytes + B * E * 4

    grid_spec = pltpu.PrefetchScalarGridSpec(
        num_scalar_prefetch=0,
        grid=(B, N // tile_n),
        in_specs=[
            pl.BlockSpec((pl.Squeezed(), tile_n, C), lambda b, n: (b, n, 0)),  # z tile
            pl.BlockSpec((C, E), lambda b, n: (0, 0)),                         # c_w1 (resident)
            pl.BlockSpec((1, E), lambda b, n: (0, 0)),                         # c_b1 (resident)
            pl.BlockSpec((E, E), lambda b, n: (0, 0)),                         # c_w2 (resident)
            pl.BlockSpec((pl.Squeezed(), 1, E), lambda b, n: (b, 0, 0)),       # t + c_b2
        ],
        out_specs=pl.BlockSpec((pl.Squeezed(), tile_n, E), lambda b, n: (b, n, 0)),
    )

    return pl.pallas_call(
        _cond_embed_kernel,
        out_shape=jax.ShapeDtypeStruct((B, N, E), z.dtype),
        grid_spec=grid_spec,
        compiler_params=pltpu.CompilerParams(
            dimension_semantics=("parallel", "parallel"),   # no carried state -> fully parallel
            vmem_limit_bytes=vmem_limit),
        cost_estimate=pl.CostEstimate(flops=int(flops),
                                      transcendentals=int(transcendentals),
                                      bytes_accessed=int(bytes_accessed)),
    )(z, params["c_w1"], params["c_b1"], params["c_w2"], t_plus_b2)


# ------------------------------ pure-JAX reference ----------------------------

def reference_time_cond_embed(timestep, z, params, freq_dim=256):
    B, N, C = z.shape
    fe = _freq_embed(timestep, freq_dim, params["t_w1"].dtype)
    t = _projector(fe, params["t_w1"], params["t_b1"], params["t_w2"], params["t_b2"])
    c = _projector(z.reshape(B * N, C), params["c_w1"], params["c_b1"],
                   params["c_w2"], params["c_b2"]).reshape(B, N, -1)
    return (c + t[:, None, :]).astype(z.dtype)


# ----------------------------------- params -----------------------------------

def init_params(key, cond_dim, embed_dim, freq_dim=256, dtype=jnp.bfloat16):
    ks = jax.random.split(key, 8)

    def lin_w(k, fan_in, fan_out):
        bound = 1.0 / math.sqrt(fan_in)
        return jax.random.uniform(k, (fan_in, fan_out), jnp.float32, -bound, bound).astype(dtype)

    def lin_b(k, fan_in, fan_out):
        bound = 1.0 / math.sqrt(fan_in)
        return jax.random.uniform(k, (1, fan_out), jnp.float32, -bound, bound).astype(dtype)

    return {
        # timestep_proj: Linear(freq_dim, embed_dim), Linear(embed_dim, embed_dim)
        "t_w1": lin_w(ks[0], freq_dim, embed_dim),
        "t_b1": lin_b(ks[1], freq_dim, embed_dim),
        "t_w2": lin_w(ks[2], embed_dim, embed_dim),
        "t_b2": lin_b(ks[3], embed_dim, embed_dim),
        # condition_proj: Linear(cond_dim, embed_dim), Linear(embed_dim, embed_dim)
        "c_w1": lin_w(ks[4], cond_dim, embed_dim),
        "c_b1": lin_b(ks[5], cond_dim, embed_dim),
        "c_w2": lin_w(ks[6], embed_dim, embed_dim),
        "c_b2": lin_b(ks[7], embed_dim, embed_dim),
    }


if __name__ == "__main__":
    B, N = 2, 1024
    cond_dim, embed_dim, freq_dim = 128, 256, 256
    dtype = jnp.bfloat16   # bf16 weights/activations, f32 MXU accumulation inside the kernel

    key = jax.random.PRNGKey(0)
    k_p, k_t, k_z = jax.random.split(key, 3)
    params = init_params(k_p, cond_dim, embed_dim, freq_dim, dtype)

    timestep = jax.random.uniform(k_t, (B,), jnp.float32, 0.0, 1000.0)
    z = jax.random.normal(k_z, (B, N, cond_dim), jnp.float32).astype(dtype)

    out = time_cond_embed(timestep, z, params, freq_dim, tile_n=512)
    out = jax.block_until_ready(out)

    ref = reference_time_cond_embed(timestep, z, params, freq_dim)
    assert out.shape == (B, N, embed_dim)
    assert out.dtype == z.dtype
    assert jnp.allclose(out.astype(jnp.float32), ref.astype(jnp.float32),
                        atol=5e-2, rtol=5e-2), "mismatch vs reference"

    print("KERNEL_OK")
</pallas_src>

<mosaic_0001>
module attributes {stable_mosaic.version = 11 : i64} {
  func.func @_cond_embed_kernel(%arg0: i32, %arg1: i32, %arg2: memref<1x512x128xbf16, #tpu.memory_space<vmem>>, %arg3: memref<128x256xbf16, #tpu.memory_space<vmem>>, %arg4: memref<1x256xbf16, #tpu.memory_space<vmem>>, %arg5: memref<256x256xbf16, #tpu.memory_space<vmem>>, %arg6: memref<1x1x256xf32, #tpu.memory_space<vmem>>, %arg7: memref<1x512x256xbf16, #tpu.memory_space<vmem>>) attributes {dimension_semantics = [#tpu.dimension_semantics<parallel>, #tpu.dimension_semantics<parallel>], iteration_bounds = array<i64: 2, 2>, scalar_prefetch = 0 : i64, scratch_operands = 0 : i64, tpu.core_type = #tpu.core_type<tc>, window_params = [{transform_indices = @transform_0, window_bounds = array<i64: 1, 512, 128>}, {pipeline_mode = #tpu.pipeline_mode<synchronous>, transform_indices = @transform_1, window_bounds = array<i64: 128, 256>}, {pipeline_mode = #tpu.pipeline_mode<synchronous>, transform_indices = @transform_2, window_bounds = array<i64: 1, 256>}, {pipeline_mode = #tpu.pipeline_mode<synchronous>, transform_indices = @transform_3, window_bounds = array<i64: 256, 256>}, {transform_indices = @transform_4, window_bounds = array<i64: 1, 1, 256>}, {transform_indices = @transform_5, window_bounds = array<i64: 1, 512, 256>}]} {
    %c0 = arith.constant 0 : index
    %c0_0 = arith.constant 0 : index
    %c0_1 = arith.constant 0 : index
    %0 = vector.load %arg2[%c0, %c0_0, %c0_1] : memref<1x512x128xbf16, #tpu.memory_space<vmem>>, vector<1x512x128xbf16>
    %1 = vector.shape_cast %0 : vector<1x512x128xbf16> to vector<512x128xbf16>
    %c0_2 = arith.constant 0 : index
    %c0_3 = arith.constant 0 : index
    %2 = vector.load %arg3[%c0_2, %c0_3] : memref<128x256xbf16, #tpu.memory_space<vmem>>, vector<128x256xbf16>
    %cst = arith.constant dense<0.000000e+00> : vector<512x256xf32>
    %3 = tpu.matmul %1, %2, %cst {dimension_numbers = #tpu.dot_dimension_numbers<[1], [0], [0], [1], [0, 0, 1, 1], [], []>} : vector<512x128xbf16>, vector<128x256xbf16>, vector<512x256xf32> -> vector<512x256xf32>
    %4 = arith.truncf %3 : vector<512x256xf32> to vector<512x256xbf16>
    %c0_4 = arith.constant 0 : index
    %c0_5 = arith.constant 0 : index
    %5 = vector.load %arg4[%c0_4, %c0_5] : memref<1x256xbf16, #tpu.memory_space<vmem>>, vector<1x256xbf16>
    %6 = vector.broadcast %5 : vector<1x256xbf16> to vector<512x256xbf16>
    %7 = arith.addf %4, %6 : vector<512x256xbf16>
    %8 = arith.negf %7 : vector<512x256xbf16>
    %9 = math.exp %8 : vector<512x256xbf16>
    %cst_6 = arith.constant 1.000000e+00 : bf16
    %10 = vector.broadcast %cst_6 : bf16 to vector<512x256xbf16>
    %11 = arith.addf %10, %9 : vector<512x256xbf16>
    %12 = arith.divf %10, %11 : vector<512x256xbf16>
    %13 = arith.mulf %7, %12 : vector<512x256xbf16>
    %c0_7 = arith.constant 0 : index
    %c0_8 = arith.constant 0 : index
    %14 = vector.load %arg5[%c0_7, %c0_8] : memref<256x256xbf16, #tpu.memory_space<vmem>>, vector<256x256xbf16>
    %cst_9 = arith.constant dense<0.000000e+00> : vector<512x256xf32>
    %15 = tpu.matmul %13, %14, %cst_9 {dimension_numbers = #tpu.dot_dimension_numbers<[1], [0], [0], [1], [0, 0, 1, 1], [], []>} : vector<512x256xbf16>, vector<256x256xbf16>, vector<512x256xf32> -> vector<512x256xf32>
    %c0_10 = arith.constant 0 : index
    %c0_11 = arith.constant 0 : index
    %c0_12 = arith.constant 0 : index
    %16 = vector.load %arg6[%c0_10, %c0_11, %c0_12] : memref<1x1x256xf32, #tpu.memory_space<vmem>>, vector<1x1x256xf32>
    %17 = vector.shape_cast %16 : vector<1x1x256xf32> to vector<1x256xf32>
    %18 = vector.broadcast %17 : vector<1x256xf32> to vector<512x256xf32>
    %19 = arith.addf %15, %18 : vector<512x256xf32>
    %20 = arith.truncf %19 : vector<512x256xf32> to vector<512x256xbf16>
    %c0_13 = arith.constant 0 : index
    %c0_14 = arith.constant 0 : index
    %c0_15 = arith.constant 0 : index
    %21 = vector.load %arg7[%c0_13, %c0_14, %c0_15] : memref<1x512x256xbf16, #tpu.memory_space<vmem>>, vector<1x512x256xbf16>
    %22 = vector.shape_cast %21 : vector<1x512x256xbf16> to vector<512x256xbf16>
    %23 = vector.shape_cast %20 : vector<512x256xbf16> to vector<1x512x256xbf16>
    tpu.vector_store %arg7[%c0_13, %c0_14, %c0_15], %23 {strides = array<i32>} : memref<1x512x256xbf16, #tpu.memory_space<vmem>>, vector<1x512x256xbf16>,
    return
  }
  func.func @transform_0(%arg0: i32, %arg1: i32) -> (i32, i32, i32) {
    %c0_i32 = arith.constant 0 : i32
    %c0_i32_0 = arith.constant 0 : i32
    return %arg0, %arg1, %c0_i32 : i32, i32, i32
  }
  func.func @transform_1(%arg0: i32, %arg1: i32) -> (i32, i32) {
    %c0_i32 = arith.constant 0 : i32
    %c0_i32_0 = arith.constant 0 : i32
    %c0_i32_1 = arith.constant 0 : i32
    return %c0_i32, %c0_i32_0 : i32, i32
  }
  func.func @transform_2(%arg0: i32, %arg1: i32) -> (i32, i32) {
    %c0_i32 = arith.constant 0 : i32
    %c0_i32_0 = arith.constant 0 : i32
    %c0_i32_1 = arith.constant 0 : i32
    return %c0_i32, %c0_i32_0 : i32, i32
  }
  func.func @transform_3(%arg0: i32, %arg1: i32) -> (i32, i32) {
    %c0_i32 = arith.constant 0 : i32
    %c0_i32_0 = arith.constant 0 : i32
    %c0_i32_1 = arith.constant 0 : i32
    return %c0_i32, %c0_i32_0 : i32, i32
  }
  func.func @transform_4(%arg0: i32, %arg1: i32) -> (i32, i32, i32) {
    %c0_i32 = arith.constant 0 : i32
    %c0_i32_0 = arith.constant 0 : i32
    %c0_i32_1 = arith.constant 0 : i32
    return %arg0, %c0_i32, %c0_i32_0 : i32, i32, i32
  }
  func.func @transform_5(%arg0: i32, %arg1: i32) -> (i32, i32, i32) {
    %c0_i32 = arith.constant 0 : i32
    %c0_i32_0 = arith.constant 0 : i32
    return %arg0, %arg1, %c0_i32 : i32, i32, i32
  }
}

</mosaic_0001>

<bundles_post_ra>
// kernel: tpu_custom_call.1
= control target key start
LH: loop header
LB: loop body
LE: loop exit
PB: predicated region body
PF: predicated region fallthrough
CT: control target
= control target key end

     0   :  { %s4681_s0 = inlined_call_operand.hbm [shape: bf16[2,1024,128], index: 0, kind: input, shape index: {}]   ;;  %s4682_s1 = inlined_call_operand.hbm [shape: bf16[128,256], index: 1, kind: input, shape index: {}]   ;;  %s4683_s2 = inlined_call_operand.vmem [shape: bf16[1,256], index: 2, kind: input, shape index: {}]   ;;  %s4684_s3 = inlined_call_operand.hbm [shape: bf16[256,256], index: 3, kind: input, shape index: {}]   ;;  %s4685_s4 = inlined_call_operand.vmem [shape: f32[2,1,256], index: 4, kind: input, shape index: {}]   ;;  %s4686_s5 = inlined_call_operand.hbm [shape: bf16[2,1024,256], index: 5, kind: output, shape index: {}]  }
   0x1   :  { %4696 = sst [smem:[#allocation17_spill]] %s4682_s1 }
   0x2   :  { %4697 = sst [smem:[#allocation18_spill]] %s4684_s3 }
   0x3   :  { %4698 = sst [smem:[#allocation19_spill]] %s4686_s5 }
   0x4   :  { %10 = vsyncpa [#allocation3], 0 }
   0x5   :  { %12 = vsyncpa [#allocation3 + $0x1], 0 }
   0x6   :  { %13 = vsyncpa [#allocation6], 0 }
   0x7   :  { %14 = vsyncpa [#allocation4], 0 }
   0x8   :  { %16 = vsyncpa [#allocation4 + $0x1], 0  ;;  %s3857_s18 = smov 0   ;;  %s3859_s19 = smov 0  }
   0x9   :  { %s3861_s20 = smov 0   ;;  %s3863_s21 = smov 0  }
   0xa   :  { %s3865_s22 = smov 0   ;;  %s3867_s23 = smov 0  }
   0xb   :  { %s3869_s24 = smov 0   ;;  %s3871_s25 = smov 0  }
   0xc LB: > { %4699 = sst [smem:[#allocation12_spill]] %s3785_s18  ;;  %s2837_s26 = sadd.s32 4294967295, %s3813_s25   ;;  %s3813_s25 = sphi %s3871_s25, %s22_s25   ;;  %s3809_s24 = sphi %s3869_s24, %s4730_s24   ;;  %s3805_s23 = sphi %s3867_s23, %s4729_s23   ;;  %s3801_s22 = sphi %s3865_s22, %s4728_s22   ;;  %s3797_s21 = sphi %s3863_s21, %s4727_s21   ;;  %s3793_s20 = sphi %s3861_s20, %s4726_s20   ;;  %s3789_s19 = sphi %s3859_s19, %s4725_s19   ;;  %s3785_s18 = sphi %s3857_s18, %s4724_s18  }
   0xd   : > { %4700 = sst [smem:[#allocation13_spill]] %s3797_s21  ;;  %s2838_s27 = sadd.s32 4294967294, %s3813_s25  }
   0xe   : > { %p56_p0 = scmp.ne.s32.totalorder %s3789_s19, %s3785_s18  ;;  %p3901_p1 = scmp.eq.s32.totalorder %s2837_s26, 0 }
   0xf   : > { %p3905_p2 = scmp.eq.s32.totalorder %s2837_s26, 3  ;;  %p177_p3 = scmp.eq.s32.totalorder %s2838_s27, 3 }
  0x10   : > { %s4701_s28 = scalar_select %p3901_p1, 1, 0 }
  0x11   : > { %p3911_p4 = por %p3901_p1, %p56_p0  ;;  %p2839_p5 = scmp.ge.s32.totalorder %s3813_s25, 1 }
  0x12   : > { %p3916_p6 = por %p177_p3, %p56_p0  ;;  %p184_p7 = scmp.lt.s32.totalorder %s3813_s25, 5 }
  0x13   : > { %s4703_s30 = scalar_select %p3911_p4, 1, 0 }
  0x14   : > { %s4704_s6 = scalar_select %p3916_p6, 1, 0 }
  0x15   : > { %p3921_p8 = pnand %p2839_p5, %p184_p7  ;;  %s3815_s8 = smov [#allocation5]  }
  0x16   : > { %4705 = sst [smem:[#allocation14_spill]] %s4704_s6  ;;  %s196_s9 = sshll.u32 %s3815_s8, 4  ;;  %s197_s9 = int_to_ptr.vmem [resolvable:$true] %s196_s9 }
  0x17   : > { %p3178_p9 = pneg %p3921_p8  ;;  %s3816_s11 = smov [#allocation7]  }
  0x18   : > { %s212_s12 = sshll.u32 %s3816_s11, 4  ;;  %s3644_s13 = scalar_lea.vmem %s197_s9, 2048  ;;  %s213_s12 = int_to_ptr.vmem [resolvable:$true] %s212_s12 }
  0x19   : > { %p3929_p10 = pnand %p3178_p9, %p3901_p1  ;;  %p3645_p12 = scmp.ne.s32.totalorder %s197_s9, %s3644_s13 }
  0x1a   : > { %p3652_p3 = scmp.lt.s32.totalorder %s197_s9, %s197_s9  ;;  %p3653_p5 = scmp.lt.s32.totalorder %s3644_s13, %s3644_s13 }
  0x1b   : > { %p3635_p11 = pneg %p3929_p10 }
  0x1c   : > { %p3654_p7 = por %p3653_p5, %p3652_p3 }
  0x1d   : > { %p3647_p13 = pnand %p3645_p12, %p3635_p11 }
  0x1f   : > { %p3648_p0 = pneg %p3647_p13 }
  0x21   : > { %p3655_p9 = pnand %p3654_p7, %p3648_p0 }
  0x23   : > { %3658 = shalt.err (!%p3655_p9)
}
  0x24   : > { %s3817_s14 = smov 128   ;;  %s3818_s15 = smov 8  }
  0x25   : > { %s4708_s1 = sld [smem:[#allocation17_spill]]  ;;  %s3670_s26 = scalar_lea.vmem %s213_s12, 4096 }
  0x26   : > { %p3671_p6 = scmp.ne.s32.totalorder %s213_s12, %s3670_s26  ;;  %p3678_p1 = scmp.lt.s32.totalorder %s213_s12, %s213_s12 }
  0x27   : > { %p3679_p4 = scmp.lt.s32.totalorder %s3670_s26, %s3670_s26 }
  0x28   : > { %p3673_p12 = pnand %p3671_p6, %p3635_p11 }
  0x29   : > { %p3680_p3 = por %p3679_p4, %p3678_p1 }
  0x2a   : > { %p3674_p13 = pneg %p3673_p12 }
  0x2b   : > { %3181 = dma.hbm_to_vmem [thread:$0]  (!%p3929_p10), %s4708_s1, 2048, %s197_s9, [#allocation6], %s3817_s14, %s3817_s14, %s3818_s15  }
  0x2c   : > { %p3681_p0 = pnand %p3680_p3, %p3674_p13 }
  0x2e   : > { %3684 = shalt.err (!%p3681_p0)
}
  0x2f   : > { %s4709_s3 = sld [smem:[#allocation18_spill]]  ;;  %s31_s9 = sadd.s32 1, %s3805_s23 }
  0x30   : > { %s34_s11 = sadd.s32 1, %s3809_s24  ;;  %p32_p1 = scmp.ge.s32.totalorder %s31_s9, 2 }
  0x31   : > { %s43_s10 = sadd.s32 1, %s3793_s20  ;;  %p50_p4 = scmp.ne.s32.totalorder %s3793_s20, %s3789_s19 }
  0x32   : > { %p51_p6 = scmp.eq.s32.totalorder %s3813_s25, 0  ;;  %s4732_s9 = smov (%p32_p1, %s31_s9), 0 }
  0x33   : > { %4710 = sst [smem:[#allocation15_spill]] %s4732_s9  ;;  %s4734_s11 = smov (!%p32_p1, %s34_s11), %s3809_s24 }
  0x34   : > { %s39_s13 = ssub.s32 %s3805_s23, %s4732_s9  ;;  %p3962_p11 = por %p51_p6, %p50_p4 }
  0x35   : > { %3184 = dma.hbm_to_vmem [thread:$0]  (!%p3929_p10), %s4709_s3, 4096, %s213_s12, [#allocation6], %s3817_s14, %s3817_s14, %s3818_s15  }
  0x36   : > { %p36_p10 = scmp.ge.s32.totalorder %s4734_s11, 2  ;;  %p3968_p5 = por %p3905_p2, %p50_p4 }
  0x37   : > { %p3195_p7 = scmp.lt.s32.totalorder %s3813_s25, 4  ;;  %s226_s14 = sand.u32 1, %s3793_s20  }
  0x38   : > { %s4712_s12 = scalar_select %p3968_p5, 1, 0 }
  0x39   : > { %s4736_s11 = smov (%p36_p10, %s4734_s11), 0  ;;  %s2843_s15 = sshll.u32 %s226_s14, 8 }
  0x3a   : > { %4713 = sst [smem:[#allocation16_spill]] %s4712_s12  ;;  %s38_s17 = ssub.s32 %s3809_s24, %s4736_s11 }
  0x3b   : > { %s40_s26 = sor.u32 %s39_s13, %s38_s17  ;;  %s2844_s27 = sshll.u32 %s3805_s23, 6 }
  0x3c   : > { %p41_p9 = scmp.eq.s32.totalorder %s40_s26, 0  ;;  %s2845_s8 = sshll.u32 %s3809_s24, 7 }
  0x3d   : > { %s236_s1 = sadd.s32 %s2845_s8, %s2844_s27  ;;  %s230_s3 = scalar_lea.vmem [#allocation2], %s2843_s15 }
  0x3e   : > { %s239_s29 = sshll.u32 %s230_s3, 4  ;;  %s2846_s6 = sshll.u32 %s236_s1, 6  ;;  %s240_s29 = int_to_ptr.vmem [resolvable:$true] %s239_s29 }
  0x3f   : > { %s3981_s9 = scalar_select %p41_p9, %s3793_s20, %s43_s10  }
  0x40   : > { %s238_s12 = scalar_lea.hbm %s4681_s0, %s2846_s6  ;;  %p3990_p2 = pnand %p3195_p7, %p3962_p11 }
  0x41   : > { %s227_s13 = scalar_lea.sflag [#allocation3], %s226_s14  ;;  %s3698_s15 = scalar_lea.vmem %s240_s29, 4096 }
  0x42   : > { %p3687_p12 = pneg %p3990_p2  ;;  %p3699_p13 = scmp.ne.s32.totalorder %s240_s29, %s3698_s15 }
  0x43   : > { %s3819_s1 = smov [#allocation2]  }
  0x44   : > { %p3701_p3 = pnand %p3699_p13, %p3687_p12  ;;  %s3703_s3 = sshll.u32 %s3819_s1, 4  ;;  %s3704_s3 = int_to_ptr.vmem [resolvable:$false] %s3703_s3 }
  0x45   : > { %s3705_s10 = scalar_lea.vmem %s3704_s3, 8192  ;;  %p3706_p1 = scmp.lt.s32.totalorder %s240_s29, %s3704_s3 }
  0x46   : > { %p3702_p0 = pneg %p3701_p3  ;;  %p3707_p4 = scmp.lt.s32.totalorder %s3705_s10, %s3698_s15 }
  0x48   : > { %p3708_p6 = por %p3707_p4, %p3706_p1 }
  0x4a   : > { %p3709_p10 = pnand %p3708_p6, %p3702_p0 }
  0x4c   : > { %3712 = shalt.err (!%p3709_p10)
}
  0x4d   : > { %s3820_s5 = smov 64   ;;  %s3821_s18 = smov 4  }
  0x4e   : > { %3188 = dma.hbm_to_vmem [thread:$0]  (!%p3990_p2), %s238_s12, 4096, %s240_s29, %s227_s13, %s3820_s5, %s3820_s5, %s3821_s18  }
  0x4f   : > { %258 = sbr.rel (%p3921_p8) target bundleno = 829 (0x33d), region = 40  ;;  %s4001_s6 = sand.u32 (!%p3921_p8), 1, %s3789_s19  }
  0x50   : > { %s2848_s16 = sshll.u32 (!%p3921_p8), %s4001_s6, 8  ;;  %s261_s14 = scalar_lea.sflag (!%p3921_p8), [#allocation3], %s4001_s6 }
  0x51   : > { %s4005_s17 = scalar_lea.vmem (!%p3921_p8), [#allocation2], %s2848_s16  ;;  %p4715_p11 = scmp.ne.s32.totalorder (!%p3921_p8), %s4703_s30, 0 }
  0x54   : > { %3772 = dma.done.wait (%p4715_p11), %s261_s14, 4096  }
  0x55   : > { %3774 = vsyncadd (%p4715_p11), %s261_s14, 4294963200  ;;  %p4716_p7 = scmp.ne.s32.totalorder %s4701_s28, 0 }
  0x57   : > { %3776 = dma.done.wait (%p4716_p7), [#allocation6], 6144  }
  0x58   : > { %3778 = vsyncadd (%p4716_p7), [#allocation6], 4294961152  ;;  %v3822_v0 = vmov 0   ;;  %v3273_v1 = vld [vmem:[#allocation5 + $0x74] ss:$8 sps:$4 sm:$0xff]   ;;  %v3297_v17 = vld [vmem:[%s4005_s17] sm:$0xff]  }
  0x59   : > { %695 = vmatprep.mubr.bf16.mxu0 %v3822_v0  ;;  %v3275_v2 = vld [vmem:[#allocation5 + $0x70] ss:$8 sps:$4 sm:$0xff]   ;;  %663 = vmatprep.subr.bf16.mxu0 %v3273_v1  ;;  %v3276_v3 = vld [vmem:[#allocation5 + $0x64] ss:$8 sps:$4 sm:$0xff]   ;;  %v3278_v4 = vld [vmem:[#allocation5 + $0x60] ss:$8 sps:$4 sm:$0xff]  }
  0x5a   : > { %664 = vmatpush1.bf16.msra.mxu0 %v3275_v2  ;;  %v3279_v5 = vld [vmem:[#allocation5 + $0x54] ss:$8 sps:$4 sm:$0xff]   ;;  %v3281_v6 = vld [vmem:[#allocation5 + $0x50] ss:$8 sps:$4 sm:$0xff]   ;;  %v3282_v7 = vld [vmem:[#allocation5 + $0x44] ss:$8 sps:$4 sm:$0xff]  }
  0x5b   : > { %665 = vmatprep.subr.bf16.mxu0 %v3276_v3  ;;  %v3284_v8 = vld [vmem:[#allocation5 + $0x40] ss:$8 sps:$4 sm:$0xff]   ;;  %v3285_v9 = vld [vmem:[#allocation5 + $0x34] ss:$8 sps:$4 sm:$0xff]   ;;  %v3287_v10 = vld [vmem:[#allocation5 + $0x30] ss:$8 sps:$4 sm:$0xff]  }
  0x5c   : > { %v3288_v11 = vld [vmem:[#allocation5 + $0x24] ss:$8 sps:$4 sm:$0xff]   ;;  %v3290_v12 = vld [vmem:[#allocation5 + $0x20] ss:$8 sps:$4 sm:$0xff]   ;;  %v3291_v13 = vld [vmem:[#allocation5 + $0x14] ss:$8 sps:$4 sm:$0xff]  }
  0x5d   : > { %v3293_v14 = vld [vmem:[#allocation5 + $0x10] ss:$8 sps:$4 sm:$0xff]   ;;  %v3294_v15 = vld [vmem:[#allocation5 + $0x4] ss:$8 sps:$4 sm:$0xff]   ;;  %v3296_v16 = vld [vmem:[#allocation5] ss:$8 sps:$4 sm:$0xff]  }
  0x5e   : > { %666 = vmatpush1.bf16.msra.mxu0 %v3278_v4  ;;  %v3298_v18 = vld [vmem:[%s4005_s17 + $0x8] sm:$0xff]   ;;  %v3299_v19 = vld [vmem:[%s4005_s17 + $0x10] sm:$0xff]   ;;  %v3300_v20 = vld [vmem:[%s4005_s17 + $0x18] sm:$0xff]   ;;  %p304_p8 = scmp.lt.s32.totalorder %s3801_s22, 1  ;;  %s2851_s8 = sshll.u32 %s4001_s6, 9 }
  0x5f   : > { %667 = vmatprep.subr.bf16.mxu0 %v3279_v5  ;;  %v3301_v21 = vld [vmem:[%s4005_s17 + $0x20] sm:$0xff]   ;;  %v3302_v22 = vld [vmem:[%s4005_s17 + $0x28] sm:$0xff]   ;;  %v3303_v23 = vld [vmem:[%s4005_s17 + $0x30] sm:$0xff]   ;;  %s4420_s29 = scalar_lea.vmem [#allocation8], %s2851_s8  ;;  %s4717_s13 = sld [smem:[#allocation13_spill]] }
  0x60   : > { %v3304_v24 = vld [vmem:[%s4005_s17 + $0x38] sm:$0xff]   ;;  %v3305_v25 = vld [vmem:[%s4005_s17 + $0x40] sm:$0xff]   ;;  %v3306_v30 = vld [vmem:[%s4005_s17 + $0x48] sm:$0xff]   ;;  %s305_s30 = scalar_select %p304_p8, %s3801_s22, 1 }
  0x61   : > { %v3324_v26 = vld [vmem:[#allocation7 + $0x74] ss:$8 sps:$4 sm:$0xff]   ;;  %v3322_v27 = vld [vmem:[#allocation7 + $0x70] ss:$8 sps:$4 sm:$0xff]   ;;  %v3327_v28 = vld [vmem:[#allocation7 + $0x64] ss:$8 sps:$4 sm:$0xff]  }
  0x62   : > { %668 = vmatpush1.bf16.msra.mxu0 %v3281_v6  ;;  %3134 = vmatprep.subr.bf16.mxu1 %v3324_v26  ;;  %v3325_v29 = vld [vmem:[#allocation7 + $0x60] ss:$8 sps:$4 sm:$0xff]   ;;  %v3331_v31 = vld [vmem:[#allocation7 + $0x54] ss:$8 sps:$4 sm:$0xff]   ;;  %v3329_v32 = vld [vmem:[#allocation7 + $0x50] ss:$8 sps:$4 sm:$0xff]  }
  0x63   : > { %669 = vmatprep.subr.bf16.mxu0 %v3282_v7  ;;  %3150 = vmatpush1.bf16.msra.mxu1 %v3322_v27  ;;  %v3334_v33 = vld [vmem:[#allocation7 + $0x44] ss:$8 sps:$4 sm:$0xff]   ;;  %v3332_v34 = vld [vmem:[#allocation7 + $0x40] ss:$8 sps:$4 sm:$0xff]   ;;  %v3307_v35 = vld [vmem:[%s4005_s17 + $0x50] sm:$0xff]   ;;  %s2852_s7 = sshll.u32 %s305_s30, 1 }
  0x64   : > { %3135 = vmatprep.subr.bf16.mxu1 %v3327_v28  ;;  %v3338_v36 = vld [vmem:[#allocation7 + $0x34] ss:$8 sps:$4 sm:$0xff]   ;;  %v3336_v37 = vld [vmem:[#allocation7 + $0x30] ss:$8 sps:$4 sm:$0xff]   ;;  %v3341_v38 = vld [vmem:[#allocation7 + $0x24] ss:$8 sps:$4 sm:$0xff]   ;;  %s307_s27 = scalar_lea.vmem %s4685_s4, %s2852_s7 }
  0x65   : > { %v3339_v39 = vld [vmem:[#allocation7 + $0x20] ss:$8 sps:$4 sm:$0xff]   ;;  %v3308_v40 = vld [vmem:[%s4005_s17 + $0x58] sm:$0xff]   ;;  %v3348_v43 = vld [vmem:[#allocation7 + $0x4] ss:$8 sps:$4 sm:$0xff]   ;;  %s3133_s15 = sshll.u32 %s4717_s13, 7 }
  0x66   : > { %670 = vmatpush1.bf16.msra.mxu0 %v3284_v8  ;;  %v3345_v41 = vld [vmem:[#allocation7 + $0x14] ss:$8 sps:$4 sm:$0xff]   ;;  %v3343_v42 = vld [vmem:[#allocation7 + $0x10] ss:$8 sps:$4 sm:$0xff]   ;;  %v3346_v44 = vld [vmem:[#allocation7] ss:$8 sps:$4 sm:$0xff]  }
  0x67   : > { %671 = vmatprep.subr.bf16.mxu0 %v3285_v9  ;;  %3151 = vmatpush1.bf16.msra.mxu1 %v3325_v29  ;;  %v3309_v45 = vld [vmem:[%s4005_s17 + $0x60] sm:$0xff]   ;;  %v3352_v46 = vld [vmem:[#allocation7 + $0xf4] ss:$8 sps:$4 sm:$0xff]   ;;  %v3350_v47 = vld [vmem:[#allocation7 + $0xf0] ss:$8 sps:$4 sm:$0xff]   ;;  %s3065_s1 = sshll.u32 %s3801_s22, 8 }
  0x68   : > { %3136 = vmatprep.subr.bf16.mxu1 %v3331_v31  ;;  %v3355_v48 = vld [vmem:[#allocation7 + $0xe4] ss:$8 sps:$4 sm:$0xff]   ;;  %v3353_v49 = vld [vmem:[#allocation7 + $0xe0] ss:$8 sps:$4 sm:$0xff]   ;;  %v3359_v51 = vld [vmem:[#allocation7 + $0xd4] ss:$8 sps:$4 sm:$0xff]   ;;  %s2713_s3 = sadd.s32 %s3133_s15, %s3065_s1 }
  0x69   : > { %v3310_v50 = vld [vmem:[%s4005_s17 + $0x68] sm:$0xff]   ;;  %v3357_v52 = vld [vmem:[#allocation7 + $0xd0] ss:$8 sps:$4 sm:$0xff]   ;;  %v3366_v56 = vld [vmem:[#allocation7 + $0xb4] ss:$8 sps:$4 sm:$0xff]   ;;  %s3066_s5 = sshll.u32 %s2713_s3, 6 }
  0x6a   : > { %672 = vmatpush1.bf16.msra.mxu0 %v3287_v10  ;;  %v3362_v53 = vld [vmem:[#allocation7 + $0xc4] ss:$8 sps:$4 sm:$0xff]   ;;  %v3360_v54 = vld [vmem:[#allocation7 + $0xc0] ss:$8 sps:$4 sm:$0xff]   ;;  %v3311_v55 = vld [vmem:[%s4005_s17 + $0x70] sm:$0xff]   ;;  %s2716_s18 = sshll.u32 %s4420_s29, 4  ;;  %s4627_s18 = int_to_ptr.vmem [resolvable:$true] %s2716_s18 }
  0x6b   : > { %673 = vmatprep.subr.bf16.mxu0 %v3288_v11  ;;  %3152 = vmatpush1.bf16.msra.mxu1 %v3329_v32  ;;  %v3364_v57 = vld [vmem:[#allocation7 + $0xb0] ss:$8 sps:$4 sm:$0xff]   ;;  %v3369_v58 = vld [vmem:[#allocation7 + $0xa4] ss:$8 sps:$4 sm:$0xff]   ;;  %v3367_v59 = vld [vmem:[#allocation7 + $0xa0] ss:$8 sps:$4 sm:$0xff]   ;;  %v1093_v11 = vlaneseq }
  0x6c   : > { %3137 = vmatprep.subr.bf16.mxu1 %v3334_v33  ;;  %v3312_v60 = vld [vmem:[%s4005_s17 + $0x78] sm:$0xff]   ;;  %v3376_v63 = vld [vmem:[#allocation7 + $0x84] ss:$8 sps:$4 sm:$0xff]   ;;  %v3374_v1 = vld [vmem:[#allocation7 + $0x80] ss:$8 sps:$4 sm:$0xff]   ;;  %s4719_s14 = sld [smem:[#allocation19_spill]] }
  0x6d   : > { %v3373_v61 = vld [vmem:[#allocation7 + $0x94] ss:$8 sps:$4 sm:$0xff]   ;;  %v3371_v62 = vld [vmem:[#allocation7 + $0x90] ss:$8 sps:$4 sm:$0xff]   ;;  %v3313_v2 = vld [vmem:[%s4005_s17 + $0x80] sm:$0xff]   ;;  %s2700_s21 = scalar_lea.sflag [#allocation4], %s4001_s6 }
  0x6e   : > { %674 = vmatpush1.bf16.msra.mxu0 %v3290_v12  ;;  %v3314_v3 = vld [vmem:[%s4005_s17 + $0x88] sm:$0xff]   ;;  %v3315_v4 = vld [vmem:[%s4005_s17 + $0x90] sm:$0xff]   ;;  %v3316_v5 = vld [vmem:[%s4005_s17 + $0x98] sm:$0xff]   ;;  %v3823_v9 = vmov 1966171168   ;;  %s3713_s28 = scalar_lea.vmem %s4627_s18, 8192 }
  0x6f   : > { %675 = vmatprep.subr.bf16.mxu0 %v3291_v13  ;;  %3153 = vmatpush1.bf16.msra.mxu1 %v3332_v34  ;;  %v3317_v6 = vld [vmem:[%s4005_s17 + $0xa0] sm:$0xff]   ;;  %v3318_v7 = vld [vmem:[%s4005_s17 + $0xa8] sm:$0xff]   ;;  %v3319_v8 = vld [vmem:[%s4005_s17 + $0xb0] sm:$0xff]   ;;  %v1091_v10 = vunpack.c.l.s4 %v3823_v9  ;;  %p3714_p9 = scmp.ne.s32.totalorder %s4627_s18, %s3713_s28  ;;  %s3824_s30 = smov [#allocation8]  }
  0x70   : > { %3138 = vmatprep.subr.bf16.mxu1 %v3338_v36  ;;  %v3320_v12 = vld [vmem:[%s4005_s17 + $0xb8] sm:$0xff]   ;;  %v2901_v13 = vld.sshfl [vmem:[%s4683_s2] sm:$0x11 pattern:$0x75316420]  ;;  %s3717_s7 = sshll.u32 %s3824_s30, 4  ;;  %s3718_s7 = int_to_ptr.vmem [resolvable:$false] %s3717_s7 }
  0x71   : > { %p3715_p2 = pnand %p3714_p9, %p3968_p5  ;;  %s3719_s12 = scalar_lea.vmem %s3718_s7, 16384 }
  0x72   : > { %676 = vmatpush1.bf16.msra.mxu0 %v3293_v14  ;;  %v1092_v14 = vunpack.c.0.s8 %v1091_v10  ;;  %p3720_p13 = scmp.lt.s32.totalorder %s4627_s18, %s3718_s7  ;;  %p3721_p3 = scmp.lt.s32.totalorder %s3719_s12, %s3713_s28 }
  0x73   : > { %677 = vmatprep.subr.bf16.mxu0 %v3294_v15  ;;  %3154 = vmatpush1.bf16.msra.mxu1 %v3336_v37  ;;  %v4066_v15 = vshrl.u32 %v1093_v11, 7  ;;  %p3716_p12 = pneg %p3715_p2 }
  0x74   : > { %3139 = vmatprep.subr.bf16.mxu1 %v3341_v38  ;;  %p3722_p0 = por %p3721_p3, %p3720_p13 }
  0x76   : > { %678 = vmatpush1.bf16.msra.mxu0 %v3296_v16  ;;  %v1089_v16 = vcombine.high %v2901_v13, %v2901_v13  ;;  %p3723_p1 = pnand %p3722_p0, %p3716_p12 }
  0x77   : > { %1898 = vmatprep.subr.bf16.mxu0 %v3324_v26  ;;  %3155 = vmatpush1.bf16.msra.mxu1 %v3339_v39 }
  0x78   : > { %3140 = vmatprep.subr.bf16.mxu1 %v3345_v41 }
  0x79   : > { %696 = vmatmul.mubr.bf16.vlgmr.msra.gmra.mxu0 %v3297_v17  ;;  %v1095_v17 = vsub.s32 %v1092_v14, %v4066_v15  ;;  %v3356_v14 = vld [vmem:[%s4005_s17 + $0xe8] sm:$0xff]  }
  0x7a   : > { %705 = vmatprep.mubr.bf16.mxu0 %v3822_v0  ;;  %1899 = vmatpush1.bf16.msra.mxu0 %v3322_v27  ;;  %v3328_v27 = vld [vmem:[%s4005_s17 + $0xc8] sm:$0xff]  }
  0x7b   : > { %1900 = vmatprep.subr.bf16.mxu0 %v3327_v28  ;;  %3156 = vmatpush1.bf16.msra.mxu1 %v3343_v42 }
  0x7c   : > { %3141 = vmatprep.subr.bf16.mxu1 %v3348_v43 }
  0x7e   : > { %1901 = vmatpush1.bf16.msra.mxu0 %v3325_v29 }
  0x7f   : > { %1902 = vmatprep.subr.bf16.mxu0 %v3331_v31  ;;  %3157 = vmatpush1.bf16.msra.mxu1 %v3346_v44 }
  0x80   : > { %3142 = vmatprep.subr.bf16.mxu1 %v3352_v46 }
  0x81   : > { %706 = vmatmul.mubr.bf16.gmra.mxu0 %v3298_v18  ;;  %v3321_v18 = vld [vmem:[%s4005_s17 + $0xc0] sm:$0xff]  }
  0x82   : > { %715 = vmatprep.mubr.bf16.mxu0 %v3822_v0  ;;  %1903 = vmatpush1.bf16.msra.mxu0 %v3329_v32 }
  0x83   : > { %1904 = vmatprep.subr.bf16.mxu0 %v3334_v33  ;;  %3158 = vmatpush2.bf16.msra.mxu1 %v3350_v47 }
  0x84   : > { %3143 = vmatprep.subr.bf16.mxu1 %v3355_v48 }
  0x86   : > { %1905 = vmatpush1.bf16.msra.mxu0 %v3332_v34 }
  0x87   : > { %1906 = vmatprep.subr.bf16.mxu0 %v3338_v36  ;;  %3159 = vmatpush2.bf16.msra.mxu1 %v3353_v49 }
  0x88   : > { %3144 = vmatprep.subr.bf16.mxu1 %v3359_v51 }
  0x89   : > { %716 = vmatmul.mubr.bf16.gmra.mxu0 %v3299_v19  ;;  %v1103_v19 = vrot.slane %v1089_v16, %v1095_v17 }
  0x8a   : > { %725 = vmatprep.mubr.bf16.mxu0 %v3822_v0  ;;  %1907 = vmatpush1.bf16.msra.mxu0 %v3336_v37 }
  0x8b   : > { %1908 = vmatprep.subr.bf16.mxu0 %v3341_v38  ;;  %3160 = vmatpush2.bf16.msra.mxu1 %v3357_v52 }
  0x8c   : > { %3145 = vmatprep.subr.bf16.mxu1 %v3362_v53 }
  0x8e   : > { %1909 = vmatpush1.bf16.msra.mxu0 %v3339_v39  ;;  %v3335_v39 = vld [vmem:[%s4005_s17 + $0xd0] sm:$0xff]  }
  0x8f   : > { %1910 = vmatprep.subr.bf16.mxu0 %v3345_v41  ;;  %3161 = vmatpush2.bf16.msra.mxu1 %v3360_v54 }
  0x90   : > { %3146 = vmatprep.subr.bf16.mxu1 %v3366_v56 }
  0x91   : > { %726 = vmatmul.mubr.bf16.gmra.mxu0 %v3300_v20 }
  0x92   : > { %735 = vmatprep.mubr.bf16.mxu0 %v3822_v0  ;;  %1911 = vmatpush1.bf16.msra.mxu0 %v3343_v42 }
  0x93   : > { %1912 = vmatprep.subr.bf16.mxu0 %v3348_v43  ;;  %3162 = vmatpush2.bf16.msra.mxu1 %v3364_v57 }
  0x94   : > { %3147 = vmatprep.subr.bf16.mxu1 %v3369_v58 }
  0x96   : > { %1913 = vmatpush1.bf16.msra.mxu0 %v3346_v44 }
  0x97   : > { %1914 = vmatprep.subr.bf16.mxu0 %v3352_v46  ;;  %3163 = vmatpush2.bf16.msra.mxu1 %v3367_v59 }
  0x98   : > { %3148 = vmatprep.subr.bf16.mxu1 %v3373_v61 }
  0x99   : > { %736 = vmatmul.mubr.bf16.gmra.mxu0 %v3301_v21  ;;  %v1096_v21 = vrot.slane %v2901_v13, %v1095_v17 }
  0x9a   : > { %745 = vmatprep.mubr.bf16.mxu0 %v3822_v0  ;;  %1915 = vmatpush2.bf16.msra.mxu0 %v3350_v47 }
  0x9b   : > { %1916 = vmatprep.subr.bf16.mxu0 %v3355_v48  ;;  %3164 = vmatpush2.bf16.msra.mxu1 %v3371_v62  ;;  %v1105_v26 = vpack.i.b16 %v1096_v21, %v1096_v21 }
  0x9c   : > { %3149 = vmatprep.subr.bf16.mxu1 %v3376_v63 }
  0x9e   : > { %1917 = vmatpush2.bf16.msra.mxu0 %v3353_v49 }
  0x9f   : > { %1918 = vmatprep.subr.bf16.mxu0 %v3359_v51  ;;  %3165 = vmatpush2.bf16.msra.mxu1 %v3374_v1 }
  0xa1   : > { %746 = vmatmul.mubr.bf16.gmra.mxu0 %v3302_v22  ;;  %v1112_v22 = vpack.i.b16 %v1103_v19, %v1103_v19 }
  0xa2   : > { %755 = vmatprep.mubr.bf16.mxu0 %v3822_v0  ;;  %1919 = vmatpush2.bf16.msra.mxu0 %v3357_v52 }
  0xa3   : > { %1920 = vmatprep.subr.bf16.mxu0 %v3362_v53 }
  0xa6   : > { %1921 = vmatpush2.bf16.msra.mxu0 %v3360_v54 }
  0xa7   : > { %1922 = vmatprep.subr.bf16.mxu0 %v3366_v56 }
  0xa9   : > { %756 = vmatmul.mubr.bf16.gmra.mxu0 %v3303_v23 }
  0xaa   : > { %765 = vmatprep.mubr.bf16.mxu0 %v3822_v0  ;;  %1923 = vmatpush2.bf16.msra.mxu0 %v3364_v57 }
  0xab   : > { %1924 = vmatprep.subr.bf16.mxu0 %v3369_v58 }
  0xae   : > { %1925 = vmatpush2.bf16.msra.mxu0 %v3367_v59 }
  0xaf   : > { %1926 = vmatprep.subr.bf16.mxu0 %v3373_v61 }
  0xb1   : > { %766 = vmatmul.mubr.bf16.gmra.mxu0 %v3304_v24  ;;  %v4073_v24 = vsub.s32 0, %v4066_v15 }
  0xb2   : > { %775 = vmatprep.mubr.bf16.mxu0 %v3822_v0  ;;  %1927 = vmatpush2.bf16.msra.mxu0 %v3371_v62 }
  0xb3   : > { %1928 = vmatprep.subr.bf16.mxu0 %v3376_v63  ;;  %v4077_v28 = vrot.slane %v1112_v22, %v4073_v24  ;;  %v4080_v32 = vrot.slane %v1105_v26, %v4073_v24  ;;  %v3349_v63 = vld [vmem:[%s4005_s17 + $0xe0] sm:$0xff]  }
  0xb6   : > { %1929 = vmatpush2.bf16.msra.mxu0 %v3374_v1 }
  0xb9   : > { %776 = vmatmul.mubr.bf16.gmra.mxu0 %v3305_v25 }
  0xba   : > { %785 = vmatprep.mubr.bf16.mxu0 %v3822_v0 }
  0xc1   : > { %786 = vmatmul.mubr.bf16.gmra.mxu0 %v3306_v30 }
  0xc2   : > { %795 = vmatprep.mubr.bf16.mxu0 %v3822_v0 }
  0xc9   : > { %796 = vmatmul.mubr.bf16.gmra.mxu0 %v3307_v35 }
  0xca   : > { %805 = vmatprep.mubr.bf16.mxu0 %v3822_v0 }
  0xd1   : > { %806 = vmatmul.mubr.bf16.gmra.mxu0 %v3308_v40 }
  0xd2   : > { %815 = vmatprep.mubr.bf16.mxu0 %v3822_v0 }
  0xd9   : > { %816 = vmatmul.mubr.bf16.gmra.mxu0 %v3309_v45 }
  0xda   : > { %825 = vmatprep.mubr.bf16.mxu0 %v3822_v0 }
  0xe1   : > { %826 = vmatmul.mubr.bf16.gmra.mxu0 %v3310_v50  ;;  %v3342_v50 = vld [vmem:[%s4005_s17 + $0xd8] sm:$0xff]  }
  0xe2   : > { %835 = vmatprep.mubr.bf16.mxu0 %v3822_v0 }
  0xe9   : > { %836 = vmatmul.mubr.bf16.gmra.mxu0 %v3311_v55 }
  0xea   : > { %845 = vmatprep.mubr.bf16.mxu0 %v3822_v0 }
  0xf1   : > { %846 = vmatmul.mubr.bf16.gmra.mxu0 %v3312_v60 }
  0xf2   : > { %855 = vmatprep.mubr.bf16.mxu0 %v3822_v0 }
  0xf9   : > { %856 = vmatmul.mubr.bf16.gmra.mxu0 %v3313_v2 }
  0xfa   : > { %865 = vmatprep.mubr.bf16.mxu0 %v3822_v0 }
 0x101   : > { %866 = vmatmul.mubr.bf16.gmra.mxu0 %v3314_v3 }
 0x102   : > { %875 = vmatprep.mubr.bf16.mxu0 %v3822_v0 }
 0x109   : > { %876 = vmatmul.mubr.bf16.gmra.mxu0 %v3315_v4 }
 0x10a   : > { %885 = vmatprep.mubr.bf16.mxu0 %v3822_v0 }
 0x111   : > { %886 = vmatmul.mubr.bf16.gmra.mxu0 %v3316_v5 }
 0x112   : > { %895 = vmatprep.mubr.bf16.mxu0 %v3822_v0 }
 0x119   : > { %896 = vmatmul.mubr.bf16.gmra.mxu0 %v3317_v6 }
 0x11a   : > { %905 = vmatprep.mubr.bf16.mxu0 %v3822_v0 }
 0x121   : > { %906 = vmatmul.mubr.bf16.gmra.mxu0 %v3318_v7 }
 0x122   : > { %915 = vmatprep.mubr.bf16.mxu0 %v3822_v0 }
 0x129   : > { %916 = vmatmul.mubr.bf16.gmra.mxu0 %v3319_v8 }
 0x12a   : > { %925 = vmatprep.mubr.bf16.mxu0 %v3822_v0 }
 0x131   : > { %926 = vmatmul.mubr.bf16.gmra.mxu0 %v3320_v12 }
 0x132   : > { %935 = vmatprep.mubr.bf16.mxu0 %v3822_v0 }
 0x139   : > { %v697_v20 = vpop.f32.mrf.mxu0  ;;  %936 = vmatmul.mubr.bf16.gmra.mxu0 %v3321_v18 }
 0x13a   : > { %945 = vmatprep.mubr.bf16.mxu0 %v3822_v0 }
 0x13b   : > { %v699_v23 = vpop.f32.mrf.mxu0 }
 0x13d   : > { %v701_v25 = vpop.f32.mrf.mxu0 }
 0x13e   : > { %v1016_v31 = vpack.c.bf16 %v701_v25, %v697_v20 }
 0x13f   : > { %v703_v29 = vpop.f32.mrf.mxu0 }
 0x140   : > { %v1017_v30 = vpack.c.bf16 %v703_v29, %v699_v23  ;;  %v4088_v37 = vadd.bf16 %v4080_v32, %v1016_v31 }
 0x141   : > { %v707_v33 = vpop.f32.mrf.mxu0  ;;  %946 = vmatmul.mubr.bf16.gmra.mxu0 %v3328_v27 }
 0x142   : > { %v4083_v34 = vadd.bf16 %v4077_v28, %v1017_v30  ;;  %955 = vmatprep.mubr.bf16.mxu0 %v3822_v0  ;;  %v2902_v42 = vmul.bf16 3216621497, %v4088_v37 }
 0x143   : > { %v709_v35 = vpop.f32.mrf.mxu0 }
 0x144   : > { %v2903_v36 = vmul.bf16 3216621497, %v4083_v34 }
 0x145   : > { %v711_v38 = vpop.f32.mrf.mxu0 }
 0x146   : > { %3377 = vpow.bf16 %v2903_v36  ;;  %v1018_v43 = vpack.c.bf16 %v711_v38, %v707_v33  ;;  %v3363_v36 = vld [vmem:[%s4005_s17 + $0xf0] sm:$0xff]  }
 0x147   : > { %v713_v40 = vpop.f32.mrf.mxu0  ;;  %3379 = vpow.bf16 %v2902_v42 }
 0x148   : > { %v1019_v41 = vpack.c.bf16 %v713_v40, %v709_v35  ;;  %v4098_v48 = vadd.bf16 %v4080_v32, %v1018_v43 }
 0x149   : > { %v717_v44 = vpop.f32.mrf.mxu0  ;;  %956 = vmatmul.mubr.bf16.gmra.mxu0 %v3335_v39 }
 0x14a   : > { %v4093_v45 = vadd.bf16 %v4077_v28, %v1019_v41  ;;  %965 = vmatprep.mubr.bf16.mxu0 %v3822_v0  ;;  %v2904_v55 = vmul.bf16 3216621497, %v4098_v48 }
 0x14b   : > { %v719_v46 = vpop.f32.mrf.mxu0 }
 0x14c   : > { %v2905_v47 = vmul.bf16 3216621497, %v4093_v45 }
 0x14d   : > { %v721_v49 = vpop.f32.mrf.mxu0 }
 0x14e   : > { %3381 = vpow.bf16 %v2905_v47  ;;  %v1020_v51 = vpack.c.bf16 %v721_v49, %v717_v44 }
 0x14f   : > { %v723_v52 = vpop.f32.mrf.mxu0 }
 0x150   : > { %v4102_v53 = vadd.bf16 %v4080_v32, %v1020_v51  ;;  %v1021_v54 = vpack.c.bf16 %v723_v52, %v719_v46 }
 0x151   : > { %v727_v56 = vpop.f32.mrf.mxu0  ;;  %966 = vmatmul.mubr.bf16.gmra.mxu0 %v3342_v50 }
 0x152   : > { %v2906_v57 = vmul.bf16 3216621497, %v4102_v53  ;;  %975 = vmatprep.mubr.bf16.mxu0 %v3822_v0  ;;  %v4108_v58 = vadd.bf16 %v4077_v28, %v1021_v54 }
 0x153   : > { %v729_v59 = vpop.f32.mrf.mxu0 }
 0x154   : > { %v3378_v60 = vpop.eup %3377  ;;  %3383 = vpow.bf16 %v2906_v57  ;;  %v2907_v61 = vmul.bf16 3216621497, %v4108_v58 }
 0x155   : > { %3385 = vpow.bf16 %v2904_v55  ;;  %v731_v62 = vpop.f32.mrf.mxu0  ;;  %v1439_v2 = vadd.bf16 1065369472, %v3378_v60  ;;  %v3380_v9 = vpop.eup %3379  ;;  %v3370_v60 = vld [vmem:[%s4005_s17 + $0xf8] sm:$0xff]   ;;  %s4625_s17 = scalar_lea.hbm %s4719_s14, %s3066_s5 }
 0x156   : > { %v1022_v1 = vpack.c.bf16 %v731_v62, %v727_v56  ;;  %3387 = vpow.bf16 %v2907_v61  ;;  %v1438_v16 = vadd.bf16 1065369472, %v3380_v9 }
 0x157   : > { %v733_v3 = vpop.f32.mrf.mxu0  ;;  %3389 = vrcp.bf16 %v1439_v2 }
 0x158   : > { %v4113_v4 = vadd.bf16 %v4080_v32, %v1022_v1  ;;  %v1023_v5 = vpack.c.bf16 %v733_v3, %v729_v59 }
 0x159   : > { %v737_v6 = vpop.f32.mrf.mxu0  ;;  %976 = vmatmul.mubr.bf16.gmra.mxu0 %v3349_v63 }
 0x15a   : > { %v2908_v7 = vmul.bf16 3216621497, %v4113_v4  ;;  %v4117_v8 = vadd.bf16 %v4077_v28, %v1023_v5  ;;  %985 = vmatprep.mubr.bf16.mxu0 %v3822_v0 }
 0x15b   : > { %v739_v10 = vpop.f32.mrf.mxu0 }
 0x15c   : > { %v3382_v11 = vpop.eup %3381  ;;  %3391 = vpow.bf16 %v2908_v7  ;;  %v2909_v12 = vmul.bf16 3216621497, %v4117_v8 }
 0x15d   : > { %v741_v13 = vpop.f32.mrf.mxu0  ;;  %v1441_v18 = vadd.bf16 1065369472, %v3382_v11 }
 0x15e   : > { %3393 = vpow.bf16 %v2909_v12  ;;  %v1024_v17 = vpack.c.bf16 %v741_v13, %v737_v6 }
 0x15f   : > { %v743_v19 = vpop.f32.mrf.mxu0  ;;  %3395 = vrcp.bf16 %v1438_v16 }
 0x160   : > { %v4123_v20 = vadd.bf16 %v4080_v32, %v1024_v17  ;;  %v1025_v21 = vpack.c.bf16 %v743_v19, %v739_v10  ;;  %3397 = vrcp.bf16 %v1441_v18 }
 0x161   : > { %v747_v22 = vpop.f32.mrf.mxu0  ;;  %986 = vmatmul.mubr.bf16.gmra.mxu0 %v3356_v14 }
 0x162   : > { %v3384_v23 = vpop.eup %3383  ;;  %v2910_v25 = vmul.bf16 3216621497, %v4123_v20  ;;  %v4127_v26 = vadd.bf16 %v4077_v28, %v1025_v21  ;;  %995 = vmatprep.mubr.bf16.mxu0 %v3822_v0 }
 0x163   : > { %v3386_v27 = vpop.eup %3385  ;;  %v1442_v29 = vadd.bf16 1065369472, %v3384_v23  ;;  %v749_v30 = vpop.f32.mrf.mxu0 }
 0x164   : > { %v3388_v31 = vpop.eup %3387  ;;  %3399 = vpow.bf16 %v2910_v25  ;;  %v2911_v33 = vmul.bf16 3216621497, %v4127_v26  ;;  %v1440_v39 = vadd.bf16 1065369472, %v3386_v27 }
 0x165   : > { %3401 = vrcp.bf16 %v1442_v29  ;;  %v751_v35 = vpop.f32.mrf.mxu0  ;;  %v1443_v38 = vadd.bf16 1065369472, %v3388_v31  ;;  %v3390_v44 = vpop.eup %3389 }
 0x166   : > { %3403 = vpow.bf16 %v2911_v33  ;;  %v1026_v40 = vpack.c.bf16 %v751_v35, %v747_v22  ;;  %v1505_v56 = vmul.bf16 1065369472, %v3390_v44 }
 0x167   : > { %v753_v41 = vpop.f32.mrf.mxu0  ;;  %3405 = vrcp.bf16 %v1443_v38 }
 0x168   : > { %v4133_v42 = vadd.bf16 %v4080_v32, %v1026_v40  ;;  %v1027_v43 = vpack.c.bf16 %v753_v41, %v749_v30  ;;  %3407 = vrcp.bf16 %v1440_v39  ;;  %v1631_v2 = vmul.bf16 %v1505_v56, %v4083_v34 }
 0x169   : > { %v757_v46 = vpop.f32.mrf.mxu0  ;;  %996 = vmatmul.mubr.bf16.gmra.mxu0 %v3363_v36 }
 0x16a   : > { %v3392_v47 = vpop.eup %3391  ;;  %v2912_v49 = vmul.bf16 3216621497, %v4133_v42  ;;  %v4137_v50 = vadd.bf16 %v4077_v28, %v1027_v43  ;;  %1005 = vmatprep.mubr.bf16.mxu0 %v3822_v0 }
 0x16b   : > { %v1444_v51 = vadd.bf16 1065369472, %v3392_v47  ;;  %v759_v52 = vpop.f32.mrf.mxu0 }
 0x16c   : > { %v3394_v54 = vpop.eup %3393  ;;  %3409 = vpow.bf16 %v2912_v49  ;;  %v2913_v55 = vmul.bf16 3216621497, %v4137_v50 }
 0x16d   : > { %3411 = vrcp.bf16 %v1444_v51  ;;  %v1445_v57 = vadd.bf16 1065369472, %v3394_v54  ;;  %v761_v59 = vpop.f32.mrf.mxu0  ;;  %v3396_v63 = vpop.eup %3395 }
 0x16e   : > { %3413 = vpow.bf16 %v2913_v55  ;;  %v1028_v61 = vpack.c.bf16 %v761_v59, %v757_v46  ;;  %v3398_v3 = vpop.eup %3397  ;;  %v1503_v11 = vmul.bf16 1065369472, %v3396_v63 }
 0x16f   : > { %v763_v62 = vpop.f32.mrf.mxu0  ;;  %3415 = vrcp.bf16 %v1445_v57  ;;  %v1509_v17 = vmul.bf16 1065369472, %v3398_v3 }
 0x170   : > { %v4143_v1 = vadd.bf16 %v4080_v32, %v1028_v61  ;;  %v1029_v0 = vpack.c.bf16 %v763_v62, %v759_v52  ;;  %v1630_v25 = vmul.bf16 %v1503_v11, %v4088_v37 }
 0x171   : > { %v767_v5 = vpop.f32.mrf.mxu0  ;;  %1006 = vmatmul.mubr.bf16.gmra.mxu0 %v3370_v60  ;;  %v1633_v33 = vmul.bf16 %v1509_v17, %v4093_v45 }
 0x172   : > { %v3400_v6 = vpop.eup %3399  ;;  %v2914_v7 = vmul.bf16 3216621497, %v4143_v1  ;;  %v4148_v9 = vadd.bf16 %v4077_v28, %v1029_v0  ;;  %1930 = vmatprep.mubr.bf16.mxu0 %v1631_v2 }
 0x173   : > { %v3402_v10 = vpop.eup %3401  ;;  %v1446_v12 = vadd.bf16 1065369472, %v3400_v6  ;;  %v769_v13 = vpop.f32.mrf.mxu0 }
 0x174   : > { %v3404_v14 = vpop.eup %3403  ;;  %3417 = vpow.bf16 %v2914_v7  ;;  %v2915_v16 = vmul.bf16 3216621497, %v4148_v9  ;;  %v1511_v21 = vmul.bf16 1065369472, %v3402_v10 }
 0x175   : > { %v3406_v34 = vpop.eup %3405  ;;  %3419 = vrcp.bf16 %v1446_v12  ;;  %v1447_v18 = vadd.bf16 1065369472, %v3404_v14  ;;  %v771_v19 = vpop.f32.mrf.mxu0 }
 0x176   : > { %3421 = vpow.bf16 %v2915_v16  ;;  %v1030_v22 = vpack.c.bf16 %v771_v19, %v767_v5  ;;  %v1513_v23 = vmul.bf16 1065369472, %v3406_v34  ;;  %v3408_v29 = vpop.eup %3407  ;;  %v1634_v38 = vmul.bf16 %v1511_v21, %v4102_v53 }
 0x177   : > { %v773_v27 = vpop.f32.mrf.mxu0  ;;  %3423 = vrcp.bf16 %v1447_v18  ;;  %v1507_v43 = vmul.bf16 1065369472, %v3408_v29 }
 0x178   : > { %v4153_v30 = vadd.bf16 %v4080_v32, %v1030_v22  ;;  %v1031_v31 = vpack.c.bf16 %v773_v27, %v769_v13  ;;  %v1635_v35 = vmul.bf16 %v1513_v23, %v4108_v58 }
 0x179   : > { %v777_v36 = vpop.f32.mrf.mxu0  ;;  %1931 = vmatmul.mubr.bf16.vlgmr.msra.gmra.mxu0 %v1630_v25  ;;  %v1632_v55 = vmul.bf16 %v1507_v43, %v4098_v48 }
 0x17a   : > { %v3410_v39 = vpop.eup %3409  ;;  %v2916_v40 = vmul.bf16 3216621497, %v4153_v30  ;;  %v4160_v37 = vadd.bf16 %v4077_v28, %v1031_v31  ;;  %1940 = vmatprep.mubr.bf16.mxu0 %v1633_v33  ;;  %1950 = vmatprep.mubr.bf16.mxu1 %v1635_v35 }
 0x17b   : > { %v3412_v41 = vpop.eup %3411  ;;  %v1448_v44 = vadd.bf16 1065369472, %v3410_v39  ;;  %v779_v46 = vpop.f32.mrf.mxu0  ;;  %1951 = vmatmul.mubr.bf16.vlgmr.msra.gmra.mxu1 %v1634_v38 }
 0x17c   : > { %v3414_v45 = vpop.eup %3413  ;;  %3425 = vpow.bf16 %v2916_v40  ;;  %v2917_v58 = vmul.bf16 3216621497, %v4160_v37  ;;  %v1515_v51 = vmul.bf16 1065369472, %v3412_v41 }
 0x17d   : > { %v3416_v47 = vpop.eup %3415  ;;  %3427 = vrcp.bf16 %v1448_v44  ;;  %v1449_v53 = vadd.bf16 1065369472, %v3414_v45  ;;  %v781_v49 = vpop.f32.mrf.mxu0 }
 0x17e   : > { %3429 = vpow.bf16 %v2917_v58  ;;  %v1032_v52 = vpack.c.bf16 %v781_v49, %v777_v36  ;;  %v1517_v54 = vmul.bf16 1065369472, %v3416_v47  ;;  %v1636_v62 = vmul.bf16 %v1515_v51, %v4113_v4 }
 0x17f   : > { %v783_v56 = vpop.f32.mrf.mxu0  ;;  %3431 = vrcp.bf16 %v1449_v53 }
 0x180   : > { %v4165_v57 = vadd.bf16 %v4080_v32, %v1032_v52  ;;  %v1033_v59 = vpack.c.bf16 %v783_v56, %v779_v46  ;;  %v1637_v60 = vmul.bf16 %v1517_v54, %v4117_v8 }
 0x181   : > { %v787_v61 = vpop.f32.mrf.mxu0  ;;  %1941 = vmatmul.mubr.bf16.gmra.mxu0 %v1632_v55 }
 0x182   : > { %v3418_v63 = vpop.eup %3417  ;;  %v2918_v0 = vmul.bf16 3216621497, %v4165_v57  ;;  %v4171_v2 = vadd.bf16 %v4077_v28, %v1033_v59  ;;  %1960 = vmatprep.mubr.bf16.mxu1 %v1637_v60 }
 0x183   : > { %v3420_v48 = vpop.eup %3419  ;;  %v1450_v3 = vadd.bf16 1065369472, %v3418_v63  ;;  %v789_v5 = vpop.f32.mrf.mxu0  ;;  %1961 = vmatmul.mubr.bf16.gmra.mxu1 %v1636_v62 }
 0x184   : > { %v3422_v6 = vpop.eup %3421  ;;  %3433 = vpow.bf16 %v2918_v0  ;;  %v2919_v7 = vmul.bf16 3216621497, %v4171_v2  ;;  %v1519_v4 = vmul.bf16 1065369472, %v3420_v48 }
 0x185   : > { %v3424_v8 = vpop.eup %3423  ;;  %3435 = vrcp.bf16 %v1450_v3  ;;  %v1451_v10 = vadd.bf16 1065369472, %v3422_v6  ;;  %v791_v11 = vpop.f32.mrf.mxu0 }
 0x186   : > { %3437 = vpow.bf16 %v2919_v7  ;;  %v1034_v12 = vpack.c.bf16 %v791_v11, %v787_v61  ;;  %v1521_v13 = vmul.bf16 1065369472, %v3424_v8  ;;  %v1638_v19 = vmul.bf16 %v1519_v4, %v4123_v20 }
 0x187   : > { %3439 = vrcp.bf16 %v1451_v10  ;;  %v793_v14 = vpop.f32.mrf.mxu0 }
 0x188   : > { %v4175_v16 = vadd.bf16 %v4080_v32, %v1034_v12  ;;  %v1035_v17 = vpack.c.bf16 %v793_v14, %v789_v5  ;;  %v1639_v34 = vmul.bf16 %v1521_v13, %v4127_v26 }
 0x189   : > { %v797_v18 = vpop.f32.mrf.mxu0 }
 0x18a   : > { %v3426_v21 = vpop.eup %3425  ;;  %v2920_v22 = vmul.bf16 3216621497, %v4175_v16  ;;  %v4181_v23 = vadd.bf16 %v4077_v28, %v1035_v17  ;;  %1970 = vmatprep.mubr.bf16.mxu1 %v1639_v34 }
 0x18b   : > { %v3428_v25 = vpop.eup %3427  ;;  %v1452_v27 = vadd.bf16 1065369472, %v3426_v21  ;;  %v799_v29 = vpop.f32.mrf.mxu0  ;;  %1971 = vmatmul.mubr.bf16.gmra.mxu1 %v1638_v19 }
 0x18c   : > { %v3430_v31 = vpop.eup %3429  ;;  %3441 = vpow.bf16 %v2920_v22  ;;  %v2921_v33 = vmul.bf16 3216621497, %v4181_v23  ;;  %v1523_v20 = vmul.bf16 1065369472, %v3428_v25 }
 0x18d   : > { %v3432_v35 = vpop.eup %3431  ;;  %3443 = vrcp.bf16 %v1452_v27  ;;  %v1453_v26 = vadd.bf16 1065369472, %v3430_v31  ;;  %v801_v36 = vpop.f32.mrf.mxu0 }
 0x18e   : > { %3445 = vpow.bf16 %v2921_v33  ;;  %v1036_v38 = vpack.c.bf16 %v801_v36, %v797_v18  ;;  %v1525_v39 = vmul.bf16 1065369472, %v3432_v35  ;;  %v1640_v45 = vmul.bf16 %v1523_v20, %v4133_v42 }
 0x18f   : > { %3447 = vrcp.bf16 %v1453_v26  ;;  %v803_v40 = vpop.f32.mrf.mxu0 }
 0x190   : > { %v4185_v41 = vadd.bf16 %v4080_v32, %v1036_v38  ;;  %v1037_v43 = vpack.c.bf16 %v803_v40, %v799_v29  ;;  %v1641_v44 = vmul.bf16 %v1525_v39, %v4137_v50 }
 0x191   : > { %v807_v46 = vpop.f32.mrf.mxu0 }
 0x192   : > { %v3434_v58 = vpop.eup %3433  ;;  %v2922_v47 = vmul.bf16 3216621497, %v4185_v41  ;;  %v4191_v53 = vadd.bf16 %v4077_v28, %v1037_v43  ;;  %1980 = vmatprep.mubr.bf16.mxu1 %v1641_v44 }
 0x193   : > { %v3436_v49 = vpop.eup %3435  ;;  %v1454_v51 = vadd.bf16 1065369472, %v3434_v58  ;;  %v809_v52 = vpop.f32.mrf.mxu0  ;;  %1981 = vmatmul.mubr.bf16.gmra.mxu1 %v1640_v45 }
 0x194   : > { %v3438_v54 = vpop.eup %3437  ;;  %3449 = vpow.bf16 %v2922_v47  ;;  %v2923_v55 = vmul.bf16 3216621497, %v4191_v53  ;;  %v1527_v42 = vmul.bf16 1065369472, %v3436_v49 }
 0x195   : > { %v3440_v56 = vpop.eup %3439  ;;  %3451 = vrcp.bf16 %v1454_v51  ;;  %v1455_v50 = vadd.bf16 1065369472, %v3438_v54  ;;  %v811_v59 = vpop.f32.mrf.mxu0 }
 0x196   : > { %3453 = vpow.bf16 %v2923_v55  ;;  %v1038_v60 = vpack.c.bf16 %v811_v59, %v807_v46  ;;  %v1529_v61 = vmul.bf16 1065369472, %v3440_v56  ;;  %v1642_v5 = vmul.bf16 %v1527_v42, %v4143_v1 }
 0x197   : > { %3455 = vrcp.bf16 %v1455_v50  ;;  %v813_v62 = vpop.f32.mrf.mxu0 }
 0x198   : > { %v4195_v63 = vadd.bf16 %v4080_v32, %v1038_v60  ;;  %v1039_v0 = vpack.c.bf16 %v813_v62, %v809_v52  ;;  %v1643_v48 = vmul.bf16 %v1529_v61, %v4148_v9 }
 0x199   : > { %v817_v3 = vpop.f32.mrf.mxu0 }
 0x19a   : > { %v3442_v6 = vpop.eup %3441  ;;  %v2924_v7 = vmul.bf16 3216621497, %v4195_v63  ;;  %v4201_v8 = vadd.bf16 %v4077_v28, %v1039_v0  ;;  %1990 = vmatprep.mubr.bf16.mxu1 %v1643_v48 }
 0x19b   : > { %v3444_v10 = vpop.eup %3443  ;;  %v1456_v11 = vadd.bf16 1065369472, %v3442_v6  ;;  %v819_v4 = vpop.f32.mrf.mxu0  ;;  %1991 = vmatmul.mubr.bf16.gmra.mxu1 %v1642_v5 }
 0x19c   : > { %v3446_v12 = vpop.eup %3445  ;;  %3457 = vpow.bf16 %v2924_v7  ;;  %v2925_v13 = vmul.bf16 3216621497, %v4201_v8  ;;  %v1531_v1 = vmul.bf16 1065369472, %v3444_v10 }
 0x19d   : > { %v3448_v14 = vpop.eup %3447  ;;  %3459 = vrcp.bf16 %v1456_v11  ;;  %v1457_v9 = vadd.bf16 1065369472, %v3446_v12  ;;  %v821_v17 = vpop.f32.mrf.mxu0 }
 0x19e   : > { %3461 = vpow.bf16 %v2925_v13  ;;  %v1040_v34 = vpack.c.bf16 %v821_v17, %v817_v3  ;;  %v1533_v18 = vmul.bf16 1065369472, %v3448_v14  ;;  %v1644_v29 = vmul.bf16 %v1531_v1, %v4153_v30 }
 0x19f   : > { %3463 = vrcp.bf16 %v1457_v9  ;;  %v823_v19 = vpop.f32.mrf.mxu0 }
 0x1a0   : > { %v4205_v21 = vadd.bf16 %v4080_v32, %v1040_v34  ;;  %v1041_v22 = vpack.c.bf16 %v823_v19, %v819_v4  ;;  %v1645_v25 = vmul.bf16 %v1533_v18, %v4160_v37 }
 0x1a1   : > { %v827_v27 = vpop.f32.mrf.mxu0 }
 0x1a2   : > { %v3450_v31 = vpop.eup %3449  ;;  %v2926_v33 = vmul.bf16 3216621497, %v4205_v21  ;;  %v4211_v35 = vadd.bf16 %v4077_v28, %v1041_v22  ;;  %2000 = vmatprep.mubr.bf16.mxu1 %v1645_v25 }
 0x1a3   : > { %v3452_v26 = vpop.eup %3451  ;;  %v1458_v36 = vadd.bf16 1065369472, %v3450_v31  ;;  %v829_v20 = vpop.f32.mrf.mxu0  ;;  %2001 = vmatmul.mubr.bf16.gmra.mxu1 %v1644_v29 }
 0x1a4   : > { %v3454_v38 = vpop.eup %3453  ;;  %3465 = vpow.bf16 %v2926_v33  ;;  %v2927_v39 = vmul.bf16 3216621497, %v4211_v35  ;;  %v1535_v30 = vmul.bf16 1065369472, %v3452_v26 }
 0x1a5   : > { %v3456_v40 = vpop.eup %3455  ;;  %3467 = vrcp.bf16 %v1458_v36  ;;  %v1459_v37 = vadd.bf16 1065369472, %v3454_v38  ;;  %v831_v43 = vpop.f32.mrf.mxu0 }
 0x1a6   : > { %3469 = vpow.bf16 %v2927_v39  ;;  %v1042_v44 = vpack.c.bf16 %v831_v43, %v827_v27  ;;  %v1537_v46 = vmul.bf16 1065369472, %v3456_v40  ;;  %v1646_v52 = vmul.bf16 %v1535_v30, %v4165_v57 }
 0x1a7   : > { %3471 = vrcp.bf16 %v1459_v37  ;;  %v833_v45 = vpop.f32.mrf.mxu0 }
 0x1a8   : > { %v4215_v58 = vadd.bf16 %v4080_v32, %v1042_v44  ;;  %v1043_v47 = vpack.c.bf16 %v833_v45, %v829_v20  ;;  %v1647_v49 = vmul.bf16 %v1537_v46, %v4171_v2 }
 0x1a9   : > { %v837_v51 = vpop.f32.mrf.mxu0 }
 0x1aa   : > { %v3458_v54 = vpop.eup %3457  ;;  %v2928_v55 = vmul.bf16 3216621497, %v4215_v58  ;;  %v4221_v56 = vadd.bf16 %v4077_v28, %v1043_v47  ;;  %2010 = vmatprep.mubr.bf16.mxu1 %v1647_v49 }
 0x1ab   : > { %v3460_v50 = vpop.eup %3459  ;;  %v1460_v59 = vadd.bf16 1065369472, %v3458_v54  ;;  %v839_v42 = vpop.f32.mrf.mxu0  ;;  %2011 = vmatmul.mubr.bf16.gmra.mxu1 %v1646_v52 }
 0x1ac   : > { %v3462_v60 = vpop.eup %3461  ;;  %3473 = vpow.bf16 %v2928_v55  ;;  %v2929_v61 = vmul.bf16 3216621497, %v4221_v56  ;;  %v1539_v57 = vmul.bf16 1065369472, %v3460_v50 }
 0x1ad   : > { %v3464_v62 = vpop.eup %3463  ;;  %3475 = vrcp.bf16 %v1460_v59  ;;  %v1461_v2 = vadd.bf16 1065369472, %v3462_v60  ;;  %v841_v0 = vpop.f32.mrf.mxu0 }
 0x1ae   : > { %3477 = vpow.bf16 %v2929_v61  ;;  %v1044_v48 = vpack.c.bf16 %v841_v0, %v837_v51  ;;  %v1541_v3 = vmul.bf16 1065369472, %v3464_v62  ;;  %v1648_v4 = vmul.bf16 %v1539_v57, %v4175_v16 }
 0x1af   : > { %3479 = vrcp.bf16 %v1461_v2  ;;  %v843_v5 = vpop.f32.mrf.mxu0 }
 0x1b0   : > { %v4225_v6 = vadd.bf16 %v4080_v32, %v1044_v48  ;;  %v1045_v7 = vpack.c.bf16 %v843_v5, %v839_v42  ;;  %v1649_v10 = vmul.bf16 %v1541_v3, %v4181_v23 }
 0x1b1   : > { %v847_v11 = vpop.f32.mrf.mxu0 }
 0x1b2   : > { %v3466_v12 = vpop.eup %3465  ;;  %v2930_v13 = vmul.bf16 3216621497, %v4225_v6  ;;  %v4231_v14 = vadd.bf16 %v4077_v28, %v1045_v7  ;;  %2020 = vmatprep.mubr.bf16.mxu1 %v1649_v10 }
 0x1b3   : > { %v3468_v9 = vpop.eup %3467  ;;  %v1462_v17 = vadd.bf16 1065369472, %v3466_v12  ;;  %v849_v1 = vpop.f32.mrf.mxu0  ;;  %2021 = vmatmul.mubr.bf16.gmra.mxu1 %v1648_v4 }
 0x1b4   : > { %v3470_v34 = vpop.eup %3469  ;;  %3481 = vpow.bf16 %v2930_v13  ;;  %v2931_v18 = vmul.bf16 3216621497, %v4231_v14  ;;  %v1543_v16 = vmul.bf16 1065369472, %v3468_v9 }
 0x1b5   : > { %v3472_v19 = vpop.eup %3471  ;;  %3483 = vrcp.bf16 %v1462_v17  ;;  %v1463_v23 = vadd.bf16 1065369472, %v3470_v34  ;;  %v851_v22 = vpop.f32.mrf.mxu0 }
 0x1b6   : > { %3485 = vpow.bf16 %v2931_v18  ;;  %v1046_v25 = vpack.c.bf16 %v851_v22, %v847_v11  ;;  %v1545_v27 = vmul.bf16 1065369472, %v3472_v19  ;;  %v1650_v20 = vmul.bf16 %v1543_v16, %v4185_v41 }
 0x1b7   : > { %3487 = vrcp.bf16 %v1463_v23  ;;  %v853_v29 = vpop.f32.mrf.mxu0 }
 0x1b8   : > { %v4235_v31 = vadd.bf16 %v4080_v32, %v1046_v25  ;;  %v1047_v33 = vpack.c.bf16 %v853_v29, %v849_v1  ;;  %v1651_v26 = vmul.bf16 %v1545_v27, %v4191_v53 }
 0x1b9   : > { %v857_v36 = vpop.f32.mrf.mxu0 }
 0x1ba   : > { %v3474_v38 = vpop.eup %3473  ;;  %v2932_v39 = vmul.bf16 3216621497, %v4235_v31  ;;  %v4241_v40 = vadd.bf16 %v4077_v28, %v1047_v33  ;;  %2030 = vmatprep.mubr.bf16.mxu1 %v1651_v26 }
 0x1bb   : > { %v3476_v37 = vpop.eup %3475  ;;  %v1464_v43 = vadd.bf16 1065369472, %v3474_v38  ;;  %v859_v30 = vpop.f32.mrf.mxu0  ;;  %2031 = vmatmul.mubr.bf16.gmra.mxu1 %v1650_v20 }
 0x1bc   : > { %v3478_v44 = vpop.eup %3477  ;;  %3489 = vpow.bf16 %v2932_v39  ;;  %v2933_v46 = vmul.bf16 3216621497, %v4241_v40  ;;  %v1547_v41 = vmul.bf16 1065369472, %v3476_v37 }
 0x1bd   : > { %v3480_v45 = vpop.eup %3479  ;;  %3491 = vrcp.bf16 %v1464_v43  ;;  %v1465_v53 = vadd.bf16 1065369472, %v3478_v44  ;;  %v861_v47 = vpop.f32.mrf.mxu0 }
 0x1be   : > { %3493 = vpow.bf16 %v2933_v46  ;;  %v1048_v49 = vpack.c.bf16 %v861_v47, %v857_v36  ;;  %v1549_v51 = vmul.bf16 1065369472, %v3480_v45  ;;  %v1652_v42 = vmul.bf16 %v1547_v41, %v4195_v63 }
 0x1bf   : > { %3495 = vrcp.bf16 %v1465_v53  ;;  %v863_v52 = vpop.f32.mrf.mxu0 }
 0x1c0   : > { %v4245_v54 = vadd.bf16 %v4080_v32, %v1048_v49  ;;  %v1049_v55 = vpack.c.bf16 %v863_v52, %v859_v30  ;;  %v1653_v50 = vmul.bf16 %v1549_v51, %v4201_v8 }
 0x1c1   : > { %v867_v59 = vpop.f32.mrf.mxu0 }
 0x1c2   : > { %v3482_v60 = vpop.eup %3481  ;;  %v2934_v61 = vmul.bf16 3216621497, %v4245_v54  ;;  %v4251_v62 = vadd.bf16 %v4077_v28, %v1049_v55  ;;  %2040 = vmatprep.mubr.bf16.mxu1 %v1653_v50 }
 0x1c3   : > { %v3484_v2 = vpop.eup %3483  ;;  %v1466_v0 = vadd.bf16 1065369472, %v3482_v60  ;;  %v869_v57 = vpop.f32.mrf.mxu0  ;;  %2041 = vmatmul.mubr.bf16.gmra.mxu1 %v1652_v42 }
 0x1c4   : > { %v3486_v48 = vpop.eup %3485  ;;  %3497 = vpow.bf16 %v2934_v61  ;;  %v2935_v3 = vmul.bf16 3216621497, %v4251_v62  ;;  %v1551_v63 = vmul.bf16 1065369472, %v3484_v2 }
 0x1c5   : > { %v3488_v5 = vpop.eup %3487  ;;  %3499 = vrcp.bf16 %v1466_v0  ;;  %v1467_v8 = vadd.bf16 1065369472, %v3486_v48  ;;  %v871_v7 = vpop.f32.mrf.mxu0 }
 0x1c6   : > { %3501 = vpow.bf16 %v2935_v3  ;;  %v1050_v10 = vpack.c.bf16 %v871_v7, %v867_v59  ;;  %v1553_v11 = vmul.bf16 1065369472, %v3488_v5  ;;  %v1654_v1 = vmul.bf16 %v1551_v63, %v4205_v21 }
 0x1c7   : > { %3503 = vrcp.bf16 %v1467_v8  ;;  %v873_v4 = vpop.f32.mrf.mxu0 }
 0x1c8   : > { %v4255_v12 = vadd.bf16 %v4080_v32, %v1050_v10  ;;  %v1051_v13 = vpack.c.bf16 %v873_v4, %v869_v57  ;;  %v1655_v9 = vmul.bf16 %v1553_v11, %v4211_v35 }
 0x1c9   : > { %v877_v17 = vpop.f32.mrf.mxu0 }
 0x1ca   : > { %v3490_v34 = vpop.eup %3489  ;;  %v2936_v18 = vmul.bf16 3216621497, %v4255_v12  ;;  %v4261_v19 = vadd.bf16 %v4077_v28, %v1051_v13  ;;  %2050 = vmatprep.mubr.bf16.mxu1 %v1655_v9 }
 0x1cb   : > { %v3492_v23 = vpop.eup %3491  ;;  %v1468_v22 = vadd.bf16 1065369472, %v3490_v34  ;;  %v879_v16 = vpop.f32.mrf.mxu0  ;;  %2051 = vmatmul.mubr.bf16.gmra.mxu1 %v1654_v1 }
 0x1cc   : > { %v3494_v25 = vpop.eup %3493  ;;  %3505 = vpow.bf16 %v2936_v18  ;;  %v2937_v27 = vmul.bf16 3216621497, %v4261_v19  ;;  %v1555_v21 = vmul.bf16 1065369472, %v3492_v23 }
 0x1cd   : > { %v3496_v29 = vpop.eup %3495  ;;  %3507 = vrcp.bf16 %v1468_v22  ;;  %v1469_v35 = vadd.bf16 1065369472, %v3494_v25  ;;  %v881_v33 = vpop.f32.mrf.mxu0 }
 0x1ce   : > { %3509 = vpow.bf16 %v2937_v27  ;;  %v1052_v26 = vpack.c.bf16 %v881_v33, %v877_v17  ;;  %v1557_v36 = vmul.bf16 1065369472, %v3496_v29  ;;  %v1656_v30 = vmul.bf16 %v1555_v21, %v4215_v58 }
 0x1cf   : > { %3511 = vrcp.bf16 %v1469_v35  ;;  %v883_v20 = vpop.f32.mrf.mxu0 }
 0x1d0   : > { %v4265_v38 = vadd.bf16 %v4080_v32, %v1052_v26  ;;  %v1053_v39 = vpack.c.bf16 %v883_v20, %v879_v16  ;;  %v1657_v37 = vmul.bf16 %v1557_v36, %v4221_v56 }
 0x1d1   : > { %v887_v43 = vpop.f32.mrf.mxu0 }
 0x1d2   : > { %v3498_v44 = vpop.eup %3497  ;;  %v2938_v46 = vmul.bf16 3216621497, %v4265_v38  ;;  %v4271_v45 = vadd.bf16 %v4077_v28, %v1053_v39  ;;  %2060 = vmatprep.mubr.bf16.mxu1 %v1657_v37 }
 0x1d3   : > { %v3500_v53 = vpop.eup %3499  ;;  %v1470_v47 = vadd.bf16 1065369472, %v3498_v44  ;;  %v889_v41 = vpop.f32.mrf.mxu0  ;;  %2061 = vmatmul.mubr.bf16.gmra.mxu1 %v1656_v30 }
 0x1d4   : > { %v3502_v49 = vpop.eup %3501  ;;  %3513 = vpow.bf16 %v2938_v46  ;;  %v2939_v51 = vmul.bf16 3216621497, %v4271_v45  ;;  %v1559_v58 = vmul.bf16 1065369472, %v3500_v53 }
 0x1d5   : > { %v3504_v52 = vpop.eup %3503  ;;  %3515 = vrcp.bf16 %v1470_v47  ;;  %v1471_v56 = vadd.bf16 1065369472, %v3502_v49  ;;  %v891_v55 = vpop.f32.mrf.mxu0 }
 0x1d6   : > { %3517 = vpow.bf16 %v2939_v51  ;;  %v1054_v50 = vpack.c.bf16 %v891_v55, %v887_v43  ;;  %v1561_v59 = vmul.bf16 1065369472, %v3504_v52  ;;  %v1658_v57 = vmul.bf16 %v1559_v58, %v4225_v6 }
 0x1d7   : > { %3519 = vrcp.bf16 %v1471_v56  ;;  %v893_v42 = vpop.f32.mrf.mxu0 }
 0x1d8   : > { %v4275_v60 = vadd.bf16 %v4080_v32, %v1054_v50  ;;  %v1055_v61 = vpack.c.bf16 %v893_v42, %v889_v41  ;;  %v1659_v2 = vmul.bf16 %v1561_v59, %v4231_v14 }
 0x1d9   : > { %v897_v0 = vpop.f32.mrf.mxu0 }
 0x1da   : > { %v3506_v48 = vpop.eup %3505  ;;  %v2940_v3 = vmul.bf16 3216621497, %v4275_v60  ;;  %v4281_v5 = vadd.bf16 %v4077_v28, %v1055_v61  ;;  %2070 = vmatprep.mubr.bf16.mxu1 %v1659_v2 }
 0x1db   : > { %v3508_v8 = vpop.eup %3507  ;;  %v1472_v7 = vadd.bf16 1065369472, %v3506_v48  ;;  %v899_v63 = vpop.f32.mrf.mxu0  ;;  %2071 = vmatmul.mubr.bf16.gmra.mxu1 %v1658_v57 }
 0x1dc   : > { %v3510_v10 = vpop.eup %3509  ;;  %3521 = vpow.bf16 %v2940_v3  ;;  %v2941_v11 = vmul.bf16 3216621497, %v4281_v5  ;;  %v1563_v6 = vmul.bf16 1065369472, %v3508_v8 }
 0x1dd   : > { %v3512_v4 = vpop.eup %3511  ;;  %3523 = vrcp.bf16 %v1472_v7  ;;  %v1473_v14 = vadd.bf16 1065369472, %v3510_v10  ;;  %v901_v13 = vpop.f32.mrf.mxu0 }
 0x1de   : > { %3525 = vpow.bf16 %v2941_v11  ;;  %v1056_v9 = vpack.c.bf16 %v901_v13, %v897_v0  ;;  %v1565_v17 = vmul.bf16 1065369472, %v3512_v4  ;;  %v1660_v16 = vmul.bf16 %v1563_v6, %v4235_v31 }
 0x1df   : > { %3527 = vrcp.bf16 %v1473_v14  ;;  %v903_v1 = vpop.f32.mrf.mxu0 }
 0x1e0   : > { %v4285_v34 = vadd.bf16 %v4080_v32, %v1056_v9  ;;  %v1057_v18 = vpack.c.bf16 %v903_v1, %v899_v63  ;;  %v1661_v23 = vmul.bf16 %v1565_v17, %v4241_v40 }
 0x1e1   : > { %v907_v22 = vpop.f32.mrf.mxu0 }
 0x1e2   : > { %v3514_v25 = vpop.eup %3513  ;;  %v2942_v27 = vmul.bf16 3216621497, %v4285_v34  ;;  %v4291_v29 = vadd.bf16 %v4077_v28, %v1057_v18  ;;  %2080 = vmatprep.mubr.bf16.mxu1 %v1661_v23 }
 0x1e3   : > { %v3516_v35 = vpop.eup %3515  ;;  %v1474_v33 = vadd.bf16 1065369472, %v3514_v25  ;;  %v909_v21 = vpop.f32.mrf.mxu0  ;;  %2081 = vmatmul.mubr.bf16.gmra.mxu1 %v1660_v16 }
 0x1e4   : > { %v3518_v26 = vpop.eup %3517  ;;  %3529 = vpow.bf16 %v2942_v27  ;;  %v2943_v36 = vmul.bf16 3216621497, %v4291_v29  ;;  %v1567_v31 = vmul.bf16 1065369472, %v3516_v35 }
 0x1e5   : > { %v3520_v20 = vpop.eup %3519  ;;  %3531 = vrcp.bf16 %v1474_v33  ;;  %v1475_v40 = vadd.bf16 1065369472, %v3518_v26  ;;  %v911_v39 = vpop.f32.mrf.mxu0 }
 0x1e6   : > { %3533 = vpow.bf16 %v2943_v36  ;;  %v1058_v37 = vpack.c.bf16 %v911_v39, %v907_v22  ;;  %v1569_v43 = vmul.bf16 1065369472, %v3520_v20  ;;  %v1662_v41 = vmul.bf16 %v1567_v31, %v4245_v54 }
 0x1e7   : > { %3535 = vrcp.bf16 %v1475_v40  ;;  %v913_v30 = vpop.f32.mrf.mxu0 }
 0x1e8   : > { %v4295_v44 = vadd.bf16 %v4080_v32, %v1058_v37  ;;  %v1059_v46 = vpack.c.bf16 %v913_v30, %v909_v21  ;;  %v1663_v53 = vmul.bf16 %v1569_v43, %v4251_v62 }
 0x1e9   : > { %v917_v47 = vpop.f32.mrf.mxu0 }
 0x1ea   : > { %v3522_v49 = vpop.eup %3521  ;;  %v2944_v51 = vmul.bf16 3216621497, %v4295_v44  ;;  %v4301_v52 = vadd.bf16 %v4077_v28, %v1059_v46  ;;  %2090 = vmatprep.mubr.bf16.mxu1 %v1663_v53 }
 0x1eb   : > { %v3524_v56 = vpop.eup %3523  ;;  %v1476_v55 = vadd.bf16 1065369472, %v3522_v49  ;;  %v919_v58 = vpop.f32.mrf.mxu0  ;;  %2091 = vmatmul.mubr.bf16.gmra.mxu1 %v1662_v41 }
 0x1ec   : > { %v3526_v50 = vpop.eup %3525  ;;  %3537 = vpow.bf16 %v2944_v51  ;;  %v2945_v59 = vmul.bf16 3216621497, %v4301_v52  ;;  %v1571_v54 = vmul.bf16 1065369472, %v3524_v56 }
 0x1ed   : > { %v3528_v42 = vpop.eup %3527  ;;  %3539 = vrcp.bf16 %v1476_v55  ;;  %v1477_v62 = vadd.bf16 1065369472, %v3526_v50  ;;  %v921_v61 = vpop.f32.mrf.mxu0 }
 0x1ee   : > { %3541 = vpow.bf16 %v2945_v59  ;;  %v1060_v2 = vpack.c.bf16 %v921_v61, %v917_v47  ;;  %v1573_v0 = vmul.bf16 1065369472, %v3528_v42  ;;  %v1664_v63 = vmul.bf16 %v1571_v54, %v4255_v12 }
 0x1ef   : > { %3543 = vrcp.bf16 %v1477_v62  ;;  %v923_v57 = vpop.f32.mrf.mxu0 }
 0x1f0   : > { %v4305_v48 = vadd.bf16 %v4080_v32, %v1060_v2  ;;  %v1061_v3 = vpack.c.bf16 %v923_v57, %v919_v58  ;;  %v1665_v8 = vmul.bf16 %v1573_v0, %v4261_v19 }
 0x1f1   : > { %v927_v7 = vpop.f32.mrf.mxu0 }
 0x1f2   : > { %v3530_v10 = vpop.eup %3529  ;;  %v2946_v11 = vmul.bf16 3216621497, %v4305_v48  ;;  %v4311_v4 = vadd.bf16 %v4077_v28, %v1061_v3  ;;  %2100 = vmatprep.mubr.bf16.mxu1 %v1665_v8 }
 0x1f3   : > { %v3532_v14 = vpop.eup %3531  ;;  %v1478_v13 = vadd.bf16 1065369472, %v3530_v10  ;;  %v929_v6 = vpop.f32.mrf.mxu0  ;;  %2101 = vmatmul.mubr.bf16.gmra.mxu1 %v1664_v63 }
 0x1f4   : > { %v3534_v9 = vpop.eup %3533  ;;  %3545 = vpow.bf16 %v2946_v11  ;;  %v2947_v17 = vmul.bf16 3216621497, %v4311_v4  ;;  %v1575_v12 = vmul.bf16 1065369472, %v3532_v14 }
 0x1f5   : > { %v3536_v1 = vpop.eup %3535  ;;  %3547 = vrcp.bf16 %v1478_v13  ;;  %v1479_v19 = vadd.bf16 1065369472, %v3534_v9  ;;  %v931_v18 = vpop.f32.mrf.mxu0 }
 0x1f6   : > { %3549 = vpow.bf16 %v2947_v17  ;;  %v1062_v23 = vpack.c.bf16 %v931_v18, %v927_v7  ;;  %v1577_v22 = vmul.bf16 1065369472, %v3536_v1  ;;  %v1666_v21 = vmul.bf16 %v1575_v12, %v4265_v38 }
 0x1f7   : > { %3551 = vrcp.bf16 %v1479_v19  ;;  %v933_v16 = vpop.f32.mrf.mxu0 }
 0x1f8   : > { %v4315_v25 = vadd.bf16 %v4080_v32, %v1062_v23  ;;  %v1063_v27 = vpack.c.bf16 %v933_v16, %v929_v6  ;;  %v1667_v35 = vmul.bf16 %v1577_v22, %v4271_v45 }
 0x1f9   : > { %v937_v33 = vpop.f32.mrf.mxu0 }
 0x1fa   : > { %v3538_v26 = vpop.eup %3537  ;;  %v2948_v36 = vmul.bf16 3216621497, %v4315_v25  ;;  %v4321_v20 = vadd.bf16 %v4077_v28, %v1063_v27  ;;  %2110 = vmatprep.mubr.bf16.mxu1 %v1667_v35 }
 0x1fb   : > { %v3540_v40 = vpop.eup %3539  ;;  %v1480_v39 = vadd.bf16 1065369472, %v3538_v26  ;;  %v939_v31 = vpop.f32.mrf.mxu0  ;;  %2111 = vmatmul.mubr.bf16.gmra.mxu1 %v1666_v21 }
 0x1fc   : > { %v3542_v37 = vpop.eup %3541  ;;  %3553 = vpow.bf16 %v2948_v36  ;;  %v2949_v43 = vmul.bf16 3216621497, %v4321_v20  ;;  %v1579_v38 = vmul.bf16 1065369472, %v3540_v40 }
 0x1fd   : > { %v3544_v30 = vpop.eup %3543  ;;  %3555 = vrcp.bf16 %v1480_v39  ;;  %v1481_v45 = vadd.bf16 1065369472, %v3542_v37  ;;  %v941_v46 = vpop.f32.mrf.mxu0 }
 0x1fe   : > { %3557 = vpow.bf16 %v2949_v43  ;;  %v1064_v53 = vpack.c.bf16 %v941_v46, %v937_v33  ;;  %v1581_v47 = vmul.bf16 1065369472, %v3544_v30  ;;  %v1668_v58 = vmul.bf16 %v1579_v38, %v4275_v60 }
 0x1ff   : > { %3559 = vrcp.bf16 %v1481_v45  ;;  %v943_v41 = vpop.f32.mrf.mxu0 }
 0x200   : > { %v4325_v49 = vadd.bf16 %v4080_v32, %v1064_v53  ;;  %v1065_v51 = vpack.c.bf16 %v943_v41, %v939_v31  ;;  %v1669_v56 = vmul.bf16 %v1581_v47, %v4281_v5 }
 0x201   : > { %v947_v55 = vpop.f32.mrf.mxu0 }
 0x202   : > { %v3546_v50 = vpop.eup %3545  ;;  %v2950_v59 = vmul.bf16 3216621497, %v4325_v49  ;;  %v4331_v42 = vadd.bf16 %v4077_v28, %v1065_v51  ;;  %2120 = vmatprep.mubr.bf16.mxu1 %v1669_v56 }
 0x203   : > { %v3548_v62 = vpop.eup %3547  ;;  %v1482_v61 = vadd.bf16 1065369472, %v3546_v50  ;;  %v949_v54 = vpop.f32.mrf.mxu0  ;;  %2121 = vmatmul.mubr.bf16.gmra.mxu1 %v1668_v58 }
 0x204   : > { %v3550_v2 = vpop.eup %3549  ;;  %3561 = vpow.bf16 %v2950_v59  ;;  %v2951_v0 = vmul.bf16 3216621497, %v4331_v42  ;;  %v1583_v60 = vmul.bf16 1065369472, %v3548_v62 }
 0x205   : > { %v3552_v57 = vpop.eup %3551  ;;  %3563 = vrcp.bf16 %v1482_v61  ;;  %v1483_v5 = vadd.bf16 1065369472, %v3550_v2  ;;  %v951_v3 = vpop.f32.mrf.mxu0 }
 0x206   : > { %3565 = vpow.bf16 %v2951_v0  ;;  %v1066_v8 = vpack.c.bf16 %v951_v3, %v947_v55  ;;  %v1585_v7 = vmul.bf16 1065369472, %v3552_v57  ;;  %v1670_v6 = vmul.bf16 %v1583_v60, %v4285_v34 }
 0x207   : > { %3567 = vrcp.bf16 %v1483_v5  ;;  %v953_v63 = vpop.f32.mrf.mxu0 }
 0x208   : > { %v4335_v10 = vadd.bf16 %v4080_v32, %v1066_v8  ;;  %v1067_v11 = vpack.c.bf16 %v953_v63, %v949_v54  ;;  %v1671_v14 = vmul.bf16 %v1585_v7, %v4291_v29 }
 0x209   : > { %v957_v13 = vpop.f32.mrf.mxu0 }
 0x20a   : > { %v3554_v9 = vpop.eup %3553  ;;  %v2952_v17 = vmul.bf16 3216621497, %v4335_v10  ;;  %v4341_v1 = vadd.bf16 %v4077_v28, %v1067_v11  ;;  %2130 = vmatprep.mubr.bf16.mxu1 %v1671_v14 }
 0x20b   : > { %v3556_v19 = vpop.eup %3555  ;;  %v1484_v18 = vadd.bf16 1065369472, %v3554_v9  ;;  %v959_v12 = vpop.f32.mrf.mxu0  ;;  %2131 = vmatmul.mubr.bf16.gmra.mxu1 %v1670_v6 }
 0x20c   : > { %v3558_v23 = vpop.eup %3557  ;;  %3569 = vpow.bf16 %v2952_v17  ;;  %v2953_v22 = vmul.bf16 3216621497, %v4341_v1  ;;  %v1587_v34 = vmul.bf16 1065369472, %v3556_v19 }
 0x20d   : > { %v3560_v16 = vpop.eup %3559  ;;  %3571 = vrcp.bf16 %v1484_v18  ;;  %v1485_v29 = vadd.bf16 1065369472, %v3558_v23  ;;  %v961_v27 = vpop.f32.mrf.mxu0 }
 0x20e   : > { %3573 = vpow.bf16 %v2953_v22  ;;  %v1068_v35 = vpack.c.bf16 %v961_v27, %v957_v13  ;;  %v1589_v33 = vmul.bf16 1065369472, %v3560_v16  ;;  %v1672_v31 = vmul.bf16 %v1587_v34, %v4295_v44 }
 0x20f   : > { %3575 = vrcp.bf16 %v1485_v29  ;;  %v963_v21 = vpop.f32.mrf.mxu0 }
 0x210   : > { %v4345_v26 = vadd.bf16 %v4080_v32, %v1068_v35  ;;  %v1069_v36 = vpack.c.bf16 %v963_v21, %v959_v12  ;;  %v1673_v40 = vmul.bf16 %v1589_v33, %v4301_v52 }
 0x211   : > { %v967_v39 = vpop.f32.mrf.mxu0 }
 0x212   : > { %v3562_v37 = vpop.eup %3561  ;;  %v2954_v43 = vmul.bf16 3216621497, %v4345_v26  ;;  %v4351_v30 = vadd.bf16 %v4077_v28, %v1069_v36  ;;  %2140 = vmatprep.mubr.bf16.mxu1 %v1673_v40 }
 0x213   : > { %v3564_v45 = vpop.eup %3563  ;;  %v1486_v46 = vadd.bf16 1065369472, %v3562_v37  ;;  %v969_v38 = vpop.f32.mrf.mxu0  ;;  %2141 = vmatmul.mubr.bf16.gmra.mxu1 %v1672_v31 }
 0x214   : > { %v3566_v53 = vpop.eup %3565  ;;  %3577 = vpow.bf16 %v2954_v43  ;;  %v2955_v47 = vmul.bf16 3216621497, %v4351_v30  ;;  %v1591_v44 = vmul.bf16 1065369472, %v3564_v45 }
 0x215   : > { %v3568_v41 = vpop.eup %3567  ;;  %3579 = vrcp.bf16 %v1486_v46  ;;  %v1487_v52 = vadd.bf16 1065369472, %v3566_v53  ;;  %v971_v51 = vpop.f32.mrf.mxu0 }
 0x216   : > { %3581 = vpow.bf16 %v2955_v47  ;;  %v1070_v56 = vpack.c.bf16 %v971_v51, %v967_v39  ;;  %v1593_v55 = vmul.bf16 1065369472, %v3568_v41  ;;  %v1674_v54 = vmul.bf16 %v1591_v44, %v4305_v48 }
 0x217   : > { %3583 = vrcp.bf16 %v1487_v52  ;;  %v973_v58 = vpop.f32.mrf.mxu0 }
 0x218   : > { %v4355_v50 = vadd.bf16 %v4080_v32, %v1070_v56  ;;  %v1071_v59 = vpack.c.bf16 %v973_v58, %v969_v38  ;;  %v1675_v62 = vmul.bf16 %v1593_v55, %v4311_v4 }
 0x219   : > { %v977_v61 = vpop.f32.mrf.mxu0 }
 0x21a   : > { %v3570_v2 = vpop.eup %3569  ;;  %v2956_v0 = vmul.bf16 3216621497, %v4355_v50  ;;  %v4361_v57 = vadd.bf16 %v4077_v28, %v1071_v59  ;;  %2150 = vmatprep.mubr.bf16.mxu1 %v1675_v62 }
 0x21b   : > { %v3572_v5 = vpop.eup %3571  ;;  %v1488_v3 = vadd.bf16 1065369472, %v3570_v2  ;;  %v979_v60 = vpop.f32.mrf.mxu0  ;;  %2151 = vmatmul.mubr.bf16.gmra.mxu1 %v1674_v54 }
 0x21c   : > { %v3574_v8 = vpop.eup %3573  ;;  %3585 = vpow.bf16 %v2956_v0  ;;  %v2957_v7 = vmul.bf16 3216621497, %v4361_v57  ;;  %v1595_v48 = vmul.bf16 1065369472, %v3572_v5 }
 0x21d   : > { %v3576_v63 = vpop.eup %3575  ;;  %3587 = vrcp.bf16 %v1488_v3  ;;  %v1489_v4 = vadd.bf16 1065369472, %v3574_v8  ;;  %v981_v11 = vpop.f32.mrf.mxu0 }
 0x21e   : > { %3589 = vpow.bf16 %v2957_v7  ;;  %v1072_v14 = vpack.c.bf16 %v981_v11, %v977_v61  ;;  %v1597_v13 = vmul.bf16 1065369472, %v3576_v63  ;;  %v1676_v12 = vmul.bf16 %v1595_v48, %v4315_v25 }
 0x21f   : > { %3591 = vrcp.bf16 %v1489_v4  ;;  %v983_v6 = vpop.f32.mrf.mxu0 }
 0x220   : > { %v4365_v9 = vadd.bf16 %v4080_v32, %v1072_v14  ;;  %v1073_v17 = vpack.c.bf16 %v983_v6, %v979_v60  ;;  %v1677_v19 = vmul.bf16 %v1597_v13, %v4321_v20  ;;  %v1734_v13 = vsub.s32 1, %v4066_v15 }
 0x221   : > { %v987_v18 = vpop.f32.mrf.mxu0 }
 0x222   : > { %v3578_v23 = vpop.eup %3577  ;;  %v2958_v22 = vmul.bf16 3216621497, %v4365_v9  ;;  %v4371_v16 = vadd.bf16 %v4077_v28, %v1073_v17  ;;  %2160 = vmatprep.mubr.bf16.mxu1 %v1677_v19 }
 0x223   : > { %v3580_v29 = vpop.eup %3579  ;;  %v1490_v27 = vadd.bf16 1065369472, %v3578_v23  ;;  %v989_v34 = vpop.f32.mrf.mxu0  ;;  %2161 = vmatmul.mubr.bf16.gmra.mxu1 %v1676_v12 }
 0x224   : > { %v3582_v35 = vpop.eup %3581  ;;  %3593 = vpow.bf16 %v2958_v22  ;;  %v2959_v33 = vmul.bf16 3216621497, %v4371_v16  ;;  %v1599_v36 = vmul.bf16 1065369472, %v3580_v29 }
 0x225   : > { %v3584_v20 = vpop.eup %3583  ;;  %3595 = vrcp.bf16 %v1490_v27  ;;  %v1491_v25 = vadd.bf16 1065369472, %v3582_v35  ;;  %v991_v21 = vpop.f32.mrf.mxu0 }
 0x226   : > { %3597 = vpow.bf16 %v2959_v33  ;;  %v1074_v40 = vpack.c.bf16 %v991_v21, %v987_v18  ;;  %v1601_v39 = vmul.bf16 1065369472, %v3584_v20  ;;  %v1678_v38 = vmul.bf16 %v1599_v36, %v4325_v49 }
 0x227   : > { %3599 = vrcp.bf16 %v1491_v25  ;;  %v993_v31 = vpop.f32.mrf.mxu0 }
 0x228   : > { %v4376_v37 = vadd.bf16 %v4080_v32, %v1074_v40  ;;  %v1075_v43 = vpack.c.bf16 %v993_v31, %v989_v34  ;;  %v1679_v45 = vmul.bf16 %v1601_v39, %v4331_v42 }
 0x229   : > { %v997_v46 = vpop.f32.mrf.mxu0 }
 0x22a   : > { %v3586_v53 = vpop.eup %3585  ;;  %v2960_v47 = vmul.bf16 3216621497, %v4376_v37  ;;  %v4383_v41 = vadd.bf16 %v4077_v28, %v1075_v43  ;;  %2170 = vmatprep.mubr.bf16.mxu1 %v1679_v45 }
 0x22b   : > { %v3588_v52 = vpop.eup %3587  ;;  %v1492_v51 = vadd.bf16 1065369472, %v3586_v53  ;;  %v999_v44 = vpop.f32.mrf.mxu0  ;;  %2171 = vmatmul.mubr.bf16.gmra.mxu1 %v1678_v38 }
 0x22c   : > { %v3590_v56 = vpop.eup %3589  ;;  %3601 = vpow.bf16 %v2960_v47  ;;  %v2961_v55 = vmul.bf16 3216621497, %v4383_v41  ;;  %v1603_v59 = vmul.bf16 1065369472, %v3588_v52 }
 0x22d   : > { %v3592_v42 = vpop.eup %3591  ;;  %3603 = vrcp.bf16 %v1492_v51  ;;  %v1493_v58 = vadd.bf16 1065369472, %v3590_v56  ;;  %v1001_v49 = vpop.f32.mrf.mxu0 }
 0x22e   : > { %3605 = vpow.bf16 %v2961_v55  ;;  %v1076_v62 = vpack.c.bf16 %v1001_v49, %v997_v46  ;;  %v1605_v61 = vmul.bf16 1065369472, %v3592_v42  ;;  %v1680_v60 = vmul.bf16 %v1603_v59, %v4335_v10 }
 0x22f   : > { %3607 = vrcp.bf16 %v1493_v58  ;;  %v1003_v54 = vpop.f32.mrf.mxu0 }
 0x230   : > { %v4387_v2 = vadd.bf16 %v4080_v32, %v1076_v62  ;;  %v1077_v0 = vpack.c.bf16 %v1003_v54, %v999_v44  ;;  %v1681_v5 = vmul.bf16 %v1605_v61, %v4341_v1  ;;  %v1726_v1 = vld [vmem:[%s307_s27] sm:$0x3] }
 0x231   : > { %v1007_v3 = vpop.f32.mrf.mxu0  ;;  %v4401_v22 = vrot.slane %v1726_v1, %v4073_v24  ;;  %v4403_v27 = vrot.slane %v1726_v1, %v1734_v13 }
 0x232   : > { %v3594_v8 = vpop.eup %3593  ;;  %v2962_v7 = vmul.bf16 3216621497, %v4387_v2  ;;  %v4396_v63 = vadd.bf16 %v4077_v28, %v1077_v0  ;;  %2180 = vmatprep.mubr.bf16.mxu1 %v1681_v5 }
 0x233   : > { %v3596_v4 = vpop.eup %3595  ;;  %v1494_v11 = vadd.bf16 1065369472, %v3594_v8  ;;  %v1009_v48 = vpop.f32.mrf.mxu0  ;;  %2181 = vmatmul.mubr.bf16.gmra.mxu1 %v1680_v60 }
 0x234   : > { %v3598_v14 = vpop.eup %3597  ;;  %3609 = vpow.bf16 %v2962_v7  ;;  %v2963_v6 = vmul.bf16 3216621497, %v4396_v63  ;;  %v1607_v18 = vmul.bf16 1065369472, %v3596_v4 }
 0x235   : > { %v3600_v17 = vpop.eup %3599  ;;  %3611 = vrcp.bf16 %v1494_v11  ;;  %v1495_v10 = vadd.bf16 1065369472, %v3598_v14  ;;  %v1011_v19 = vpop.f32.mrf.mxu0 }
 0x236   : > { %3613 = vpow.bf16 %v2963_v6  ;;  %v1078_v12 = vpack.c.bf16 %v1011_v19, %v1007_v3  ;;  %v1609_v23 = vmul.bf16 1065369472, %v3600_v17  ;;  %v1682_v20 = vmul.bf16 %v1607_v18, %v4345_v26 }
 0x237   : > { %3615 = vrcp.bf16 %v1495_v10  ;;  %v1013_v29 = vpop.f32.mrf.mxu0 }
 0x238   : > { %v4406_v15 = vadd.bf16 %v4080_v32, %v1078_v12  ;;  %v1079_v34 = vpack.c.bf16 %v1013_v29, %v1009_v48  ;;  %v1683_v35 = vmul.bf16 %v1609_v23, %v4351_v30 }
 0x239   : > { %v1932_v33 = vpop.f32.mrf.mxu0 }
 0x23a   : > { %v3602_v25 = vpop.eup %3601  ;;  %v2964_v21 = vmul.bf16 3216621497, %v4406_v15  ;;  %v4412_v36 = vadd.bf16 %v4077_v28, %v1079_v34  ;;  %2190 = vmatprep.mubr.bf16.mxu1 %v1683_v35  ;;  %v1933_v43 = vadd.f32 %v1932_v33, %v4401_v22 }
 0x23b   : > { %v3604_v24 = vpop.eup %3603  ;;  %v1496_v40 = vadd.bf16 1065369472, %v3602_v25  ;;  %v1934_v39 = vpop.f32.mrf.mxu0  ;;  %2191 = vmatmul.mubr.bf16.gmra.mxu1 %v1682_v20 }
 0x23c   : > { %v1952_v31 = vpop.f32.mrf.mxu1  ;;  %v3606_v32 = vpop.eup %3605  ;;  %3617 = vpow.bf16 %v2964_v21  ;;  %v2965_v30 = vmul.bf16 3216621497, %v4412_v36  ;;  %v1935_v26 = vadd.f32 %v1934_v39, %v4403_v27  ;;  %v1611_v51 = vmul.bf16 1065369472, %v3604_v24 }
 0x23d   : > { %v3608_v45 = vpop.eup %3607  ;;  %3619 = vrcp.bf16 %v1496_v40  ;;  %v1497_v46 = vadd.bf16 1065369472, %v3606_v32  ;;  %v1953_v28 = vadd.f32 %v1952_v31, %v4401_v22  ;;  %v1936_v38 = vpop.f32.mrf.mxu0 }
 0x23e   : > { %v1954_v53 = vpop.f32.mrf.mxu1  ;;  %3621 = vpow.bf16 %v2965_v30  ;;  %v3069_v47 = vpack.c.bf16 %v1935_v26, %v1933_v43  ;;  %v1613_v55 = vmul.bf16 1065369472, %v3608_v45  ;;  %v1937_v42 = vadd.f32 %v1936_v38, %v4401_v22 }
 0x23f   : > { %v1955_v52 = vadd.f32 %v1954_v53, %v4403_v27  ;;  %3623 = vrcp.bf16 %v1497_v46  ;;  %v1938_v44 = vpop.f32.mrf.mxu0  ;;  %v1684_v60 = vmul.bf16 %v1611_v51, %v4355_v50 }
 0x240   : > { %v1956_v56 = vpop.f32.mrf.mxu1  ;;  %2635 = vst [vmem:[%s4420_s29] sm:$0xff] %v3069_v47  ;;  %v1939_v49 = vadd.f32 %v1938_v44, %v4403_v27  ;;  %v1685_v61 = vmul.bf16 %v1613_v55, %v4361_v57 }
 0x241   : > { %v3073_v58 = vpack.c.bf16 %v1955_v52, %v1953_v28  ;;  %v1942_v59 = vpop.f32.mrf.mxu0  ;;  %v1957_v5 = vadd.f32 %v1956_v56, %v4401_v22 }
 0x242   : > { %v1958_v62 = vpop.f32.mrf.mxu1  ;;  %v3610_v54 = vpop.eup %3609  ;;  %v3070_v0 = vpack.c.bf16 %v1939_v49, %v1937_v42  ;;  %2200 = vmatprep.mubr.bf16.mxu1 %v1685_v61  ;;  %v1943_v14 = vadd.f32 %v1942_v59, %v4401_v22 }
 0x243   : > { %2639 = vst [vmem:[%s4420_s29 + $0x20] sm:$0xff] %v3073_v58  ;;  %v1959_v3 = vadd.f32 %v1958_v62, %v4403_v27  ;;  %v3612_v8 = vpop.eup %3611  ;;  %v1498_v7 = vadd.bf16 1065369472, %v3610_v54  ;;  %v1944_v4 = vpop.f32.mrf.mxu0  ;;  %2201 = vmatmul.mubr.bf16.gmra.mxu1 %v1684_v60 }
 0x244   : > { %v1962_v11 = vpop.f32.mrf.mxu1  ;;  %v3614_v48 = vpop.eup %3613  ;;  %2636 = vst [vmem:[%s4420_s29 + $0x8] sm:$0xff] %v3070_v0  ;;  %v1945_v1 = vadd.f32 %v1944_v4, %v4403_v27  ;;  %v1615_v23 = vmul.bf16 1065369472, %v3612_v8 }
 0x245   : > { %v3074_v57 = vpack.c.bf16 %v1959_v3, %v1957_v5  ;;  %v3616_v13 = vpop.eup %3615  ;;  %3625 = vrcp.bf16 %v1498_v7  ;;  %v1499_v6 = vadd.bf16 1065369472, %v3614_v48  ;;  %v1963_v50 = vadd.f32 %v1962_v11, %v4401_v22  ;;  %v1946_v17 = vpop.f32.mrf.mxu0 }
 0x246   : > { %v1964_v10 = vpop.f32.mrf.mxu1  ;;  %v3071_v19 = vpack.c.bf16 %v1945_v1, %v1943_v14  ;;  %v1617_v12 = vmul.bf16 1065369472, %v3616_v13  ;;  %v1947_v35 = vadd.f32 %v1946_v17, %v4401_v22  ;;  %v1686_v32 = vmul.bf16 %v1615_v23, %v4365_v9 }
 0x247   : > { %2640 = vst [vmem:[%s4420_s29 + $0x28] sm:$0xff] %v3074_v57  ;;  %v1965_v18 = vadd.f32 %v1964_v10, %v4403_v27  ;;  %3627 = vrcp.bf16 %v1499_v6  ;;  %v1948_v29 = vpop.f32.mrf.mxu0 }
 0x248   : > { %v1966_v34 = vpop.f32.mrf.mxu1  ;;  %2637 = vst [vmem:[%s4420_s29 + $0x10] sm:$0xff] %v3071_v19  ;;  %v1949_v20 = vadd.f32 %v1948_v29, %v4403_v27  ;;  %v1687_v25 = vmul.bf16 %v1617_v12, %v4371_v16 }
 0x249   : > { %v3075_v33 = vpack.c.bf16 %v1965_v18, %v1963_v50  ;;  %v1967_v39 = vadd.f32 %v1966_v34, %v4401_v22 }
 0x24a   : > { %v1968_v21 = vpop.f32.mrf.mxu1  ;;  %v3618_v24 = vpop.eup %3617  ;;  %v3072_v40 = vpack.c.bf16 %v1949_v20, %v1947_v35  ;;  %2210 = vmatprep.mubr.bf16.mxu1 %v1687_v25 }
 0x24b   : > { %2641 = vst [vmem:[%s4420_s29 + $0x30] sm:$0xff] %v3075_v33  ;;  %v1969_v31 = vadd.f32 %v1968_v21, %v4403_v27  ;;  %v3620_v30 = vpop.eup %3619  ;;  %v1500_v43 = vadd.bf16 1065369472, %v3618_v24  ;;  %2211 = vmatmul.mubr.bf16.gmra.mxu1 %v1686_v32 }
 0x24c   : > { %v1972_v26 = vpop.f32.mrf.mxu1  ;;  %v3622_v45 = vpop.eup %3621  ;;  %2638 = vst [vmem:[%s4420_s29 + $0x18] sm:$0xff] %v3072_v40  ;;  %v1619_v51 = vmul.bf16 1065369472, %v3620_v30 }
 0x24d   : > { %v3076_v46 = vpack.c.bf16 %v1969_v31, %v1967_v39  ;;  %v3624_v16 = vpop.eup %3623  ;;  %3629 = vrcp.bf16 %v1500_v43  ;;  %v1501_v28 = vadd.bf16 1065369472, %v3622_v45  ;;  %v1973_v53 = vadd.f32 %v1972_v26, %v4401_v22 }
 0x24e   : > { %v1974_v38 = vpop.f32.mrf.mxu1  ;;  %v1621_v52 = vmul.bf16 1065369472, %v3624_v16  ;;  %v1688_v49 = vmul.bf16 %v1619_v51, %v4376_v37 }
 0x24f   : > { %2642 = vst [vmem:[%s4420_s29 + $0x38] sm:$0xff] %v3076_v46  ;;  %v1975_v47 = vadd.f32 %v1974_v38, %v4403_v27  ;;  %3631 = vrcp.bf16 %v1501_v28 }
 0x250   : > { %v1976_v9 = vpop.f32.mrf.mxu1  ;;  %v1689_v56 = vmul.bf16 %v1621_v52, %v4383_v41 }
 0x251   : > { %v3077_v44 = vpack.c.bf16 %v1975_v47, %v1973_v53  ;;  %v1977_v42 = vadd.f32 %v1976_v9, %v4401_v22 }
 0x252   : > { %v1978_v55 = vpop.f32.mrf.mxu1  ;;  %2220 = vmatprep.mubr.bf16.mxu1 %v1689_v56 }
 0x253   : > { %2643 = vst [vmem:[%s4420_s29 + $0x40] sm:$0xff] %v3077_v44  ;;  %v1979_v58 = vadd.f32 %v1978_v55, %v4403_v27  ;;  %v3626_v59 = vpop.eup %3625  ;;  %2221 = vmatmul.mubr.bf16.gmra.mxu1 %v1688_v49 }
 0x254   : > { %v1982_v62 = vpop.f32.mrf.mxu1  ;;  %v1623_v5 = vmul.bf16 1065369472, %v3626_v59 }
 0x255   : > { %v3078_v61 = vpack.c.bf16 %v1979_v58, %v1977_v42  ;;  %v3628_v54 = vpop.eup %3627  ;;  %v1983_v41 = vadd.f32 %v1982_v62, %v4401_v22 }
 0x256   : > { %v1984_v0 = vpop.f32.mrf.mxu1  ;;  %v1625_v60 = vmul.bf16 1065369472, %v3628_v54  ;;  %v1690_v11 = vmul.bf16 %v1623_v5, %v4387_v2 }
 0x257   : > { %2644 = vst [vmem:[%s4420_s29 + $0x48] sm:$0xff] %v3078_v61  ;;  %v1985_v3 = vadd.f32 %v1984_v0, %v4403_v27 }
 0x258   : > { %v1986_v8 = vpop.f32.mrf.mxu1  ;;  %v1691_v4 = vmul.bf16 %v1625_v60, %v4396_v63 }
 0x259   : > { %v3079_v7 = vpack.c.bf16 %v1985_v3, %v1983_v41  ;;  %v1987_v48 = vadd.f32 %v1986_v8, %v4401_v22 }
 0x25a   : > { %v1988_v37 = vpop.f32.mrf.mxu1  ;;  %2230 = vmatprep.mubr.bf16.mxu1 %v1691_v4 }
 0x25b   : > { %2645 = vst [vmem:[%s4420_s29 + $0x50] sm:$0xff] %v3079_v7  ;;  %v1989_v14 = vadd.f32 %v1988_v37, %v4403_v27  ;;  %v3630_v57 = vpop.eup %3629  ;;  %2231 = vmatmul.mubr.bf16.gmra.mxu1 %v1690_v11 }
 0x25c   : > { %v1992_v1 = vpop.f32.mrf.mxu1  ;;  %v1627_v17 = vmul.bf16 1065369472, %v3630_v57 }
 0x25d   : > { %v3080_v13 = vpack.c.bf16 %v1989_v14, %v1987_v48  ;;  %v3632_v6 = vpop.eup %3631  ;;  %v1993_v63 = vadd.f32 %v1992_v1, %v4401_v22 }
 0x25e   : > { %v1994_v50 = vpop.f32.mrf.mxu1  ;;  %v1629_v10 = vmul.bf16 1065369472, %v3632_v6  ;;  %v1692_v29 = vmul.bf16 %v1627_v17, %v4406_v15 }
 0x25f   : > { %2646 = vst [vmem:[%s4420_s29 + $0x58] sm:$0xff] %v3080_v13  ;;  %v1995_v2 = vadd.f32 %v1994_v50, %v4403_v27 }
 0x260   : > { %v1996_v19 = vpop.f32.mrf.mxu1  ;;  %v1693_v12 = vmul.bf16 %v1629_v10, %v4412_v36 }
 0x261   : > { %v3081_v18 = vpack.c.bf16 %v1995_v2, %v1993_v63  ;;  %v1997_v34 = vadd.f32 %v1996_v19, %v4401_v22 }
 0x262   : > { %v1998_v23 = vpop.f32.mrf.mxu1  ;;  %2240 = vmatprep.mubr.bf16.mxu1 %v1693_v12 }
 0x263   : > { %2647 = vst [vmem:[%s4420_s29 + $0x60] sm:$0xff] %v3081_v18  ;;  %v1999_v35 = vadd.f32 %v1998_v23, %v4403_v27  ;;  %2241 = vmatmul.mubr.bf16.gmra.mxu1 %v1692_v29 }
 0x264   : > { %v2002_v33 = vpop.f32.mrf.mxu1 }
 0x265   : > { %v3082_v20 = vpack.c.bf16 %v1999_v35, %v1997_v34  ;;  %v2003_v21 = vadd.f32 %v2002_v33, %v4401_v22 }
 0x266   : > { %v2004_v25 = vpop.f32.mrf.mxu1 }
 0x267   : > { %2648 = vst [vmem:[%s4420_s29 + $0x68] sm:$0xff] %v3082_v20  ;;  %v2005_v36 = vadd.f32 %v2004_v25, %v4403_v27 }
 0x268   : > { %v2006_v24 = vpop.f32.mrf.mxu1 }
 0x269   : > { %v3083_v40 = vpack.c.bf16 %v2005_v36, %v2003_v21  ;;  %v2007_v39 = vadd.f32 %v2006_v24, %v4401_v22 }
 0x26a   : > { %v2008_v15 = vpop.f32.mrf.mxu1 }
 0x26b   : > { %2649 = vst [vmem:[%s4420_s29 + $0x70] sm:$0xff] %v3083_v40  ;;  %v2009_v31 = vadd.f32 %v2008_v15, %v4403_v27 }
 0x26c   : > { %v2012_v32 = vpop.f32.mrf.mxu1 }
 0x26d   : > { %v3084_v30 = vpack.c.bf16 %v2009_v31, %v2007_v39  ;;  %v2013_v26 = vadd.f32 %v2012_v32, %v4401_v22 }
 0x26e   : > { %v2014_v43 = vpop.f32.mrf.mxu1 }
 0x26f   : > { %2650 = vst [vmem:[%s4420_s29 + $0x78] sm:$0xff] %v3084_v30  ;;  %v2015_v45 = vadd.f32 %v2014_v43, %v4403_v27 }
 0x270   : > { %v2016_v46 = vpop.f32.mrf.mxu1 }
 0x271   : > { %v3085_v16 = vpack.c.bf16 %v2015_v45, %v2013_v26  ;;  %v2017_v38 = vadd.f32 %v2016_v46, %v4401_v22 }
 0x272   : > { %v2018_v28 = vpop.f32.mrf.mxu1 }
 0x273   : > { %2651 = vst [vmem:[%s4420_s29 + $0x80] sm:$0xff] %v3085_v16  ;;  %v2019_v53 = vadd.f32 %v2018_v28, %v4403_v27 }
 0x274   : > { %v2022_v47 = vpop.f32.mrf.mxu1 }
 0x275   : > { %v3086_v52 = vpack.c.bf16 %v2019_v53, %v2017_v38  ;;  %v2023_v9 = vadd.f32 %v2022_v47, %v4401_v22 }
 0x276   : > { %v2024_v51 = vpop.f32.mrf.mxu1 }
 0x277   : > { %2652 = vst [vmem:[%s4420_s29 + $0x88] sm:$0xff] %v3086_v52  ;;  %v2025_v44 = vadd.f32 %v2024_v51, %v4403_v27 }
 0x278   : > { %v2026_v56 = vpop.f32.mrf.mxu1 }
 0x279   : > { %v3087_v55 = vpack.c.bf16 %v2025_v44, %v2023_v9  ;;  %v2027_v58 = vadd.f32 %v2026_v56, %v4401_v22 }
 0x27a   : > { %v2028_v42 = vpop.f32.mrf.mxu1 }
 0x27b   : > { %2653 = vst [vmem:[%s4420_s29 + $0x90] sm:$0xff] %v3087_v55  ;;  %v2029_v49 = vadd.f32 %v2028_v42, %v4403_v27 }
 0x27c   : > { %v2032_v59 = vpop.f32.mrf.mxu1 }
 0x27d   : > { %v3088_v62 = vpack.c.bf16 %v2029_v49, %v2027_v58  ;;  %v2033_v54 = vadd.f32 %v2032_v59, %v4401_v22 }
 0x27e   : > { %v2034_v61 = vpop.f32.mrf.mxu1 }
 0x27f   : > { %2654 = vst [vmem:[%s4420_s29 + $0x98] sm:$0xff] %v3088_v62  ;;  %v2035_v0 = vadd.f32 %v2034_v61, %v4403_v27 }
 0x280   : > { %v2036_v5 = vpop.f32.mrf.mxu1 }
 0x281   : > { %v3089_v41 = vpack.c.bf16 %v2035_v0, %v2033_v54  ;;  %v2037_v60 = vadd.f32 %v2036_v5, %v4401_v22 }
 0x282   : > { %v2038_v3 = vpop.f32.mrf.mxu1 }
 0x283   : > { %2655 = vst [vmem:[%s4420_s29 + $0xa0] sm:$0xff] %v3089_v41  ;;  %v2039_v8 = vadd.f32 %v2038_v3, %v4403_v27 }
 0x284   : > { %v2042_v7 = vpop.f32.mrf.mxu1 }
 0x285   : > { %v3090_v4 = vpack.c.bf16 %v2039_v8, %v2037_v60  ;;  %v2043_v11 = vadd.f32 %v2042_v7, %v4401_v22 }
 0x286   : > { %v2044_v37 = vpop.f32.mrf.mxu1 }
 0x287   : > { %2656 = vst [vmem:[%s4420_s29 + $0xa8] sm:$0xff] %v3090_v4  ;;  %v2045_v48 = vadd.f32 %v2044_v37, %v4403_v27 }
 0x288   : > { %v2046_v14 = vpop.f32.mrf.mxu1 }
 0x289   : > { %v3091_v57 = vpack.c.bf16 %v2045_v48, %v2043_v11  ;;  %v2047_v13 = vadd.f32 %v2046_v14, %v4401_v22 }
 0x28a   : > { %v2048_v1 = vpop.f32.mrf.mxu1 }
 0x28b   : > { %2657 = vst [vmem:[%s4420_s29 + $0xb0] sm:$0xff] %v3091_v57  ;;  %v2049_v6 = vadd.f32 %v2048_v1, %v4403_v27 }
 0x28c   : > { %v2052_v50 = vpop.f32.mrf.mxu1 }
 0x28d   : > { %v3092_v17 = vpack.c.bf16 %v2049_v6, %v2047_v13  ;;  %v2053_v2 = vadd.f32 %v2052_v50, %v4401_v22 }
 0x28e   : > { %v2054_v63 = vpop.f32.mrf.mxu1 }
 0x28f   : > { %2658 = vst [vmem:[%s4420_s29 + $0xb8] sm:$0xff] %v3092_v17  ;;  %v2055_v10 = vadd.f32 %v2054_v63, %v4403_v27 }
 0x290   : > { %v2056_v19 = vpop.f32.mrf.mxu1 }
 0x291   : > { %v3093_v18 = vpack.c.bf16 %v2055_v10, %v2053_v2  ;;  %v2057_v23 = vadd.f32 %v2056_v19, %v4401_v22 }
 0x292   : > { %v2058_v12 = vpop.f32.mrf.mxu1 }
 0x293   : > { %2659 = vst [vmem:[%s4420_s29 + $0xc0] sm:$0xff] %v3093_v18  ;;  %v2059_v29 = vadd.f32 %v2058_v12, %v4403_v27 }
 0x294   : > { %v2062_v34 = vpop.f32.mrf.mxu1 }
 0x295   : > { %v3094_v35 = vpack.c.bf16 %v2059_v29, %v2057_v23  ;;  %v2063_v20 = vadd.f32 %v2062_v34, %v4401_v22 }
 0x296   : > { %v2064_v33 = vpop.f32.mrf.mxu1 }
 0x297   : > { %2660 = vst [vmem:[%s4420_s29 + $0xc8] sm:$0xff] %v3094_v35  ;;  %v2065_v25 = vadd.f32 %v2064_v33, %v4403_v27 }
 0x298   : > { %v2066_v21 = vpop.f32.mrf.mxu1 }
 0x299   : > { %v3095_v36 = vpack.c.bf16 %v2065_v25, %v2063_v20  ;;  %v2067_v40 = vadd.f32 %v2066_v21, %v4401_v22 }
 0x29a   : > { %v2068_v24 = vpop.f32.mrf.mxu1 }
 0x29b   : > { %2661 = vst [vmem:[%s4420_s29 + $0xd0] sm:$0xff] %v3095_v36  ;;  %v2069_v15 = vadd.f32 %v2068_v24, %v4403_v27 }
 0x29c   : > { %v2072_v39 = vpop.f32.mrf.mxu1 }
 0x29d   : > { %v3096_v31 = vpack.c.bf16 %v2069_v15, %v2067_v40  ;;  %v2073_v30 = vadd.f32 %v2072_v39, %v4401_v22 }
 0x29e   : > { %v2074_v32 = vpop.f32.mrf.mxu1 }
 0x29f   : > { %2662 = vst [vmem:[%s4420_s29 + $0xd8] sm:$0xff] %v3096_v31  ;;  %v2075_v43 = vadd.f32 %v2074_v32, %v4403_v27 }
 0x2a0   : > { %v2076_v26 = vpop.f32.mrf.mxu1 }
 0x2a1   : > { %v3097_v45 = vpack.c.bf16 %v2075_v43, %v2073_v30  ;;  %v2077_v16 = vadd.f32 %v2076_v26, %v4401_v22 }
 0x2a2   : > { %v2078_v46 = vpop.f32.mrf.mxu1 }
 0x2a3   : > { %2663 = vst [vmem:[%s4420_s29 + $0xe0] sm:$0xff] %v3097_v45  ;;  %v2079_v28 = vadd.f32 %v2078_v46, %v4403_v27 }
 0x2a4   : > { %v2082_v38 = vpop.f32.mrf.mxu1 }
 0x2a5   : > { %v3098_v53 = vpack.c.bf16 %v2079_v28, %v2077_v16  ;;  %v2083_v52 = vadd.f32 %v2082_v38, %v4401_v22 }
 0x2a6   : > { %v2084_v47 = vpop.f32.mrf.mxu1 }
 0x2a7   : > { %2664 = vst [vmem:[%s4420_s29 + $0xe8] sm:$0xff] %v3098_v53  ;;  %v2085_v51 = vadd.f32 %v2084_v47, %v4403_v27 }
 0x2a8   : > { %v2086_v9 = vpop.f32.mrf.mxu1 }
 0x2a9   : > { %v3099_v44 = vpack.c.bf16 %v2085_v51, %v2083_v52  ;;  %v2087_v55 = vadd.f32 %v2086_v9, %v4401_v22 }
 0x2aa   : > { %v2088_v56 = vpop.f32.mrf.mxu1 }
 0x2ab   : > { %2665 = vst [vmem:[%s4420_s29 + $0xf0] sm:$0xff] %v3099_v44  ;;  %v2089_v42 = vadd.f32 %v2088_v56, %v4403_v27 }
 0x2ac   : > { %v2092_v58 = vpop.f32.mrf.mxu1 }
 0x2ad   : > { %v3100_v49 = vpack.c.bf16 %v2089_v42, %v2087_v55  ;;  %v2093_v62 = vadd.f32 %v2092_v58, %v4401_v22 }
 0x2ae   : > { %v2094_v59 = vpop.f32.mrf.mxu1 }
 0x2af   : > { %2666 = vst [vmem:[%s4420_s29 + $0xf8] sm:$0xff] %v3100_v49  ;;  %v2095_v61 = vadd.f32 %v2094_v59, %v4403_v27 }
 0x2b0   : > { %v2096_v54 = vpop.f32.mrf.mxu1 }
 0x2b1   : > { %v3101_v0 = vpack.c.bf16 %v2095_v61, %v2093_v62  ;;  %v2097_v41 = vadd.f32 %v2096_v54, %v4401_v22 }
 0x2b2   : > { %v2098_v5 = vpop.f32.mrf.mxu1 }
 0x2b3   : > { %2667 = vst [vmem:[%s4420_s29 + $0x100] sm:$0xff] %v3101_v0  ;;  %v2099_v3 = vadd.f32 %v2098_v5, %v4403_v27 }
 0x2b4   : > { %v2102_v60 = vpop.f32.mrf.mxu1 }
 0x2b5   : > { %v3102_v8 = vpack.c.bf16 %v2099_v3, %v2097_v41  ;;  %v2103_v4 = vadd.f32 %v2102_v60, %v4401_v22 }
 0x2b6   : > { %v2104_v7 = vpop.f32.mrf.mxu1 }
 0x2b7   : > { %2668 = vst [vmem:[%s4420_s29 + $0x108] sm:$0xff] %v3102_v8  ;;  %v2105_v37 = vadd.f32 %v2104_v7, %v4403_v27 }
 0x2b8   : > { %v2106_v11 = vpop.f32.mrf.mxu1 }
 0x2b9   : > { %v3103_v48 = vpack.c.bf16 %v2105_v37, %v2103_v4  ;;  %v2107_v57 = vadd.f32 %v2106_v11, %v4401_v22 }
 0x2ba   : > { %v2108_v14 = vpop.f32.mrf.mxu1 }
 0x2bb   : > { %2669 = vst [vmem:[%s4420_s29 + $0x110] sm:$0xff] %v3103_v48  ;;  %v2109_v1 = vadd.f32 %v2108_v14, %v4403_v27 }
 0x2bc   : > { %v2112_v13 = vpop.f32.mrf.mxu1 }
 0x2bd   : > { %v3104_v6 = vpack.c.bf16 %v2109_v1, %v2107_v57  ;;  %v2113_v17 = vadd.f32 %v2112_v13, %v4401_v22 }
 0x2be   : > { %v2114_v50 = vpop.f32.mrf.mxu1 }
 0x2bf   : > { %2670 = vst [vmem:[%s4420_s29 + $0x118] sm:$0xff] %v3104_v6  ;;  %v2115_v63 = vadd.f32 %v2114_v50, %v4403_v27 }
 0x2c0   : > { %v2116_v2 = vpop.f32.mrf.mxu1 }
 0x2c1   : > { %v3105_v10 = vpack.c.bf16 %v2115_v63, %v2113_v17  ;;  %v2117_v18 = vadd.f32 %v2116_v2, %v4401_v22 }
 0x2c2   : > { %v2118_v19 = vpop.f32.mrf.mxu1 }
 0x2c3   : > { %2671 = vst [vmem:[%s4420_s29 + $0x120] sm:$0xff] %v3105_v10  ;;  %v2119_v12 = vadd.f32 %v2118_v19, %v4403_v27 }
 0x2c4   : > { %v2122_v23 = vpop.f32.mrf.mxu1 }
 0x2c5   : > { %v3106_v29 = vpack.c.bf16 %v2119_v12, %v2117_v18  ;;  %v2123_v35 = vadd.f32 %v2122_v23, %v4401_v22 }
 0x2c6   : > { %v2124_v34 = vpop.f32.mrf.mxu1 }
 0x2c7   : > { %2672 = vst [vmem:[%s4420_s29 + $0x128] sm:$0xff] %v3106_v29  ;;  %v2125_v33 = vadd.f32 %v2124_v34, %v4403_v27 }
 0x2c8   : > { %v2126_v20 = vpop.f32.mrf.mxu1 }
 0x2c9   : > { %v3107_v25 = vpack.c.bf16 %v2125_v33, %v2123_v35  ;;  %v2127_v36 = vadd.f32 %v2126_v20, %v4401_v22 }
 0x2ca   : > { %v2128_v21 = vpop.f32.mrf.mxu1 }
 0x2cb   : > { %2673 = vst [vmem:[%s4420_s29 + $0x130] sm:$0xff] %v3107_v25  ;;  %v2129_v24 = vadd.f32 %v2128_v21, %v4403_v27 }
 0x2cc   : > { %v2132_v40 = vpop.f32.mrf.mxu1 }
 0x2cd   : > { %v3108_v15 = vpack.c.bf16 %v2129_v24, %v2127_v36  ;;  %v2133_v31 = vadd.f32 %v2132_v40, %v4401_v22 }
 0x2ce   : > { %v2134_v39 = vpop.f32.mrf.mxu1 }
 0x2cf   : > { %2674 = vst [vmem:[%s4420_s29 + $0x138] sm:$0xff] %v3108_v15  ;;  %v2135_v32 = vadd.f32 %v2134_v39, %v4403_v27 }
 0x2d0   : > { %v2136_v30 = vpop.f32.mrf.mxu1 }
 0x2d1   : > { %v3109_v43 = vpack.c.bf16 %v2135_v32, %v2133_v31  ;;  %v2137_v45 = vadd.f32 %v2136_v30, %v4401_v22 }
 0x2d2   : > { %v2138_v26 = vpop.f32.mrf.mxu1 }
 0x2d3   : > { %2675 = vst [vmem:[%s4420_s29 + $0x140] sm:$0xff] %v3109_v43  ;;  %v2139_v46 = vadd.f32 %v2138_v26, %v4403_v27 }
 0x2d4   : > { %v2142_v16 = vpop.f32.mrf.mxu1 }
 0x2d5   : > { %v3110_v28 = vpack.c.bf16 %v2139_v46, %v2137_v45  ;;  %v2143_v53 = vadd.f32 %v2142_v16, %v4401_v22 }
 0x2d6   : > { %v2144_v38 = vpop.f32.mrf.mxu1 }
 0x2d7   : > { %2676 = vst [vmem:[%s4420_s29 + $0x148] sm:$0xff] %v3110_v28  ;;  %v2145_v47 = vadd.f32 %v2144_v38, %v4403_v27 }
 0x2d8   : > { %v2146_v52 = vpop.f32.mrf.mxu1 }
 0x2d9   : > { %v3111_v51 = vpack.c.bf16 %v2145_v47, %v2143_v53  ;;  %v2147_v44 = vadd.f32 %v2146_v52, %v4401_v22 }
 0x2da   : > { %v2148_v9 = vpop.f32.mrf.mxu1 }
 0x2db   : > { %2677 = vst [vmem:[%s4420_s29 + $0x150] sm:$0xff] %v3111_v51  ;;  %v2149_v56 = vadd.f32 %v2148_v9, %v4403_v27 }
 0x2dc   : > { %v2152_v55 = vpop.f32.mrf.mxu1 }
 0x2dd   : > { %v3112_v42 = vpack.c.bf16 %v2149_v56, %v2147_v44  ;;  %v2153_v49 = vadd.f32 %v2152_v55, %v4401_v22 }
 0x2de   : > { %v2154_v58 = vpop.f32.mrf.mxu1 }
 0x2df   : > { %2678 = vst [vmem:[%s4420_s29 + $0x158] sm:$0xff] %v3112_v42  ;;  %v2155_v59 = vadd.f32 %v2154_v58, %v4403_v27 }
 0x2e0   : > { %v2156_v62 = vpop.f32.mrf.mxu1 }
 0x2e1   : > { %v3113_v61 = vpack.c.bf16 %v2155_v59, %v2153_v49  ;;  %v2157_v0 = vadd.f32 %v2156_v62, %v4401_v22 }
 0x2e2   : > { %v2158_v54 = vpop.f32.mrf.mxu1 }
 0x2e3   : > { %2679 = vst [vmem:[%s4420_s29 + $0x160] sm:$0xff] %v3113_v61  ;;  %v2159_v5 = vadd.f32 %v2158_v54, %v4403_v27 }
 0x2e4   : > { %v2162_v41 = vpop.f32.mrf.mxu1 }
 0x2e5   : > { %v3114_v3 = vpack.c.bf16 %v2159_v5, %v2157_v0  ;;  %v2163_v8 = vadd.f32 %v2162_v41, %v4401_v22 }
 0x2e6   : > { %v2164_v60 = vpop.f32.mrf.mxu1 }
 0x2e7   : > { %2680 = vst [vmem:[%s4420_s29 + $0x168] sm:$0xff] %v3114_v3  ;;  %v2165_v7 = vadd.f32 %v2164_v60, %v4403_v27 }
 0x2e8   : > { %v2166_v4 = vpop.f32.mrf.mxu1 }
 0x2e9   : > { %v3115_v37 = vpack.c.bf16 %v2165_v7, %v2163_v8  ;;  %v2167_v48 = vadd.f32 %v2166_v4, %v4401_v22 }
 0x2ea   : > { %v2168_v11 = vpop.f32.mrf.mxu1 }
 0x2eb   : > { %2681 = vst [vmem:[%s4420_s29 + $0x170] sm:$0xff] %v3115_v37  ;;  %v2169_v14 = vadd.f32 %v2168_v11, %v4403_v27 }
 0x2ec   : > { %v2172_v57 = vpop.f32.mrf.mxu1 }
 0x2ed   : > { %v3116_v1 = vpack.c.bf16 %v2169_v14, %v2167_v48  ;;  %v2173_v6 = vadd.f32 %v2172_v57, %v4401_v22 }
 0x2ee   : > { %v2174_v13 = vpop.f32.mrf.mxu1 }
 0x2ef   : > { %2682 = vst [vmem:[%s4420_s29 + $0x178] sm:$0xff] %v3116_v1  ;;  %v2175_v50 = vadd.f32 %v2174_v13, %v4403_v27 }
 0x2f0   : > { %v2176_v17 = vpop.f32.mrf.mxu1 }
 0x2f1   : > { %v3117_v63 = vpack.c.bf16 %v2175_v50, %v2173_v6  ;;  %v2177_v10 = vadd.f32 %v2176_v17, %v4401_v22 }
 0x2f2   : > { %v2178_v2 = vpop.f32.mrf.mxu1 }
 0x2f3   : > { %2683 = vst [vmem:[%s4420_s29 + $0x180] sm:$0xff] %v3117_v63  ;;  %v2179_v19 = vadd.f32 %v2178_v2, %v4403_v27 }
 0x2f4   : > { %v2182_v18 = vpop.f32.mrf.mxu1 }
 0x2f5   : > { %v3118_v12 = vpack.c.bf16 %v2179_v19, %v2177_v10  ;;  %v2183_v29 = vadd.f32 %v2182_v18, %v4401_v22 }
 0x2f6   : > { %v2184_v23 = vpop.f32.mrf.mxu1 }
 0x2f7   : > { %2684 = vst [vmem:[%s4420_s29 + $0x188] sm:$0xff] %v3118_v12  ;;  %v2185_v34 = vadd.f32 %v2184_v23, %v4403_v27 }
 0x2f8   : > { %v2186_v35 = vpop.f32.mrf.mxu1 }
 0x2f9   : > { %v3119_v33 = vpack.c.bf16 %v2185_v34, %v2183_v29  ;;  %v2187_v25 = vadd.f32 %v2186_v35, %v4401_v22 }
 0x2fa   : > { %v2188_v20 = vpop.f32.mrf.mxu1 }
 0x2fb   : > { %2685 = vst [vmem:[%s4420_s29 + $0x190] sm:$0xff] %v3119_v33  ;;  %v2189_v21 = vadd.f32 %v2188_v20, %v4403_v27 }
 0x2fc   : > { %v2192_v36 = vpop.f32.mrf.mxu1 }
 0x2fd   : > { %v3120_v24 = vpack.c.bf16 %v2189_v21, %v2187_v25  ;;  %v2193_v15 = vadd.f32 %v2192_v36, %v4401_v22 }
 0x2fe   : > { %v2194_v40 = vpop.f32.mrf.mxu1 }
 0x2ff   : > { %2686 = vst [vmem:[%s4420_s29 + $0x198] sm:$0xff] %v3120_v24  ;;  %v2195_v39 = vadd.f32 %v2194_v40, %v4403_v27 }
 0x300   : > { %v2196_v31 = vpop.f32.mrf.mxu1 }
 0x301   : > { %v3121_v32 = vpack.c.bf16 %v2195_v39, %v2193_v15  ;;  %v2197_v43 = vadd.f32 %v2196_v31, %v4401_v22 }
 0x302   : > { %v2198_v30 = vpop.f32.mrf.mxu1 }
 0x303   : > { %2687 = vst [vmem:[%s4420_s29 + $0x1a0] sm:$0xff] %v3121_v32  ;;  %v2199_v26 = vadd.f32 %v2198_v30, %v4403_v27 }
 0x304   : > { %v2202_v46 = vpop.f32.mrf.mxu1 }
 0x305   : > { %v3122_v45 = vpack.c.bf16 %v2199_v26, %v2197_v43  ;;  %v2203_v28 = vadd.f32 %v2202_v46, %v4401_v22 }
 0x306   : > { %v2204_v16 = vpop.f32.mrf.mxu1 }
 0x307   : > { %2688 = vst [vmem:[%s4420_s29 + $0x1a8] sm:$0xff] %v3122_v45  ;;  %v2205_v38 = vadd.f32 %v2204_v16, %v4403_v27 }
 0x308   : > { %v2206_v53 = vpop.f32.mrf.mxu1 }
 0x309   : > { %v3123_v47 = vpack.c.bf16 %v2205_v38, %v2203_v28  ;;  %v2207_v51 = vadd.f32 %v2206_v53, %v4401_v22 }
 0x30a   : > { %v2208_v52 = vpop.f32.mrf.mxu1 }
 0x30b   : > { %2689 = vst [vmem:[%s4420_s29 + $0x1b0] sm:$0xff] %v3123_v47  ;;  %v2209_v9 = vadd.f32 %v2208_v52, %v4403_v27 }
 0x30c   : > { %v2212_v44 = vpop.f32.mrf.mxu1 }
 0x30d   : > { %v3124_v56 = vpack.c.bf16 %v2209_v9, %v2207_v51  ;;  %v2213_v42 = vadd.f32 %v2212_v44, %v4401_v22 }
 0x30e   : > { %v2214_v55 = vpop.f32.mrf.mxu1 }
 0x30f   : > { %2690 = vst [vmem:[%s4420_s29 + $0x1b8] sm:$0xff] %v3124_v56  ;;  %v2215_v58 = vadd.f32 %v2214_v55, %v4403_v27 }
 0x310   : > { %v2216_v49 = vpop.f32.mrf.mxu1 }
 0x311   : > { %v3125_v59 = vpack.c.bf16 %v2215_v58, %v2213_v42  ;;  %v2217_v61 = vadd.f32 %v2216_v49, %v4401_v22 }
 0x312   : > { %v2218_v62 = vpop.f32.mrf.mxu1 }
 0x313   : > { %2691 = vst [vmem:[%s4420_s29 + $0x1c0] sm:$0xff] %v3125_v59  ;;  %v2219_v54 = vadd.f32 %v2218_v62, %v4403_v27 }
 0x314   : > { %v2222_v0 = vpop.f32.mrf.mxu1 }
 0x315   : > { %v3126_v5 = vpack.c.bf16 %v2219_v54, %v2217_v61  ;;  %v2223_v3 = vadd.f32 %v2222_v0, %v4401_v22 }
 0x316   : > { %v2224_v41 = vpop.f32.mrf.mxu1 }
 0x317   : > { %2692 = vst [vmem:[%s4420_s29 + $0x1c8] sm:$0xff] %v3126_v5  ;;  %v2225_v60 = vadd.f32 %v2224_v41, %v4403_v27 }
 0x318   : > { %v2226_v8 = vpop.f32.mrf.mxu1 }
 0x319   : > { %v3127_v7 = vpack.c.bf16 %v2225_v60, %v2223_v3  ;;  %v2227_v37 = vadd.f32 %v2226_v8, %v4401_v22 }
 0x31a   : > { %v2228_v4 = vpop.f32.mrf.mxu1 }
 0x31b   : > { %2693 = vst [vmem:[%s4420_s29 + $0x1d0] sm:$0xff] %v3127_v7  ;;  %v2229_v11 = vadd.f32 %v2228_v4, %v4403_v27 }
 0x31c   : > { %v2232_v48 = vpop.f32.mrf.mxu1 }
 0x31d   : > { %v3128_v14 = vpack.c.bf16 %v2229_v11, %v2227_v37  ;;  %v2233_v1 = vadd.f32 %v2232_v48, %v4401_v22 }
 0x31e   : > { %v2234_v57 = vpop.f32.mrf.mxu1 }
 0x31f   : > { %2694 = vst [vmem:[%s4420_s29 + $0x1d8] sm:$0xff] %v3128_v14  ;;  %v2235_v13 = vadd.f32 %v2234_v57, %v4403_v27 }
 0x320   : > { %v2236_v6 = vpop.f32.mrf.mxu1 }
 0x321   : > { %v3129_v50 = vpack.c.bf16 %v2235_v13, %v2233_v1  ;;  %v2237_v63 = vadd.f32 %v2236_v6, %v4401_v22 }
 0x322   : > { %v2238_v17 = vpop.f32.mrf.mxu1 }
 0x323   : > { %2695 = vst [vmem:[%s4420_s29 + $0x1e0] sm:$0xff] %v3129_v50  ;;  %v2239_v2 = vadd.f32 %v2238_v17, %v4403_v27 }
 0x324   : > { %v2242_v10 = vpop.f32.mrf.mxu1 }
 0x325   : > { %v3130_v19 = vpack.c.bf16 %v2239_v2, %v2237_v63  ;;  %v2243_v12 = vadd.f32 %v2242_v10, %v4401_v22 }
 0x326   : > { %v2244_v18 = vpop.f32.mrf.mxu1 }
 0x327   : > { %2696 = vst [vmem:[%s4420_s29 + $0x1e8] sm:$0xff] %v3130_v19  ;;  %v2245_v23 = vadd.f32 %v2244_v18, %v4403_v27 }
 0x328   : > { %v2246_v29 = vpop.f32.mrf.mxu1 }
 0x329   : > { %v3131_v34 = vpack.c.bf16 %v2245_v23, %v2243_v12  ;;  %v2247_v33 = vadd.f32 %v2246_v29, %v4401_v22 }
 0x32a   : > { %v2248_v35 = vpop.f32.mrf.mxu1 }
 0x32b   : > { %2697 = vst [vmem:[%s4420_s29 + $0x1f0] sm:$0xff] %v3131_v34  ;;  %v2249_v20 = vadd.f32 %v2248_v35, %v4403_v27 }
 0x32d   : > { %v3132_v25 = vpack.c.bf16 %v2249_v20, %v2247_v33 }
 0x32f   : > { %2698 = vst [vmem:[%s4420_s29 + $0x1f8] sm:$0xff] %v3132_v25 }
 0x330   : > { %3726 = shalt.err (!%p3723_p1)
}
 0x331   : > { %s3727_s26 = scalar_lea.hbm %s4625_s17, 8192  ;;  %s3731_s29 = scalar_lea.hbm %s4719_s14, 32768 }
 0x332   : > { %p3728_p4 = scmp.ne.s32.totalorder %s4625_s17, %s3727_s26  ;;  %p3732_p11 = scmp.lt.s32.totalorder %s4625_s17, %s4719_s14 }
 0x333   : > { %p3733_p7 = scmp.lt.s32.totalorder %s3731_s29, %s3727_s26 }
 0x334   : > { %p3729_p6 = pnand %p3728_p4, %p3968_p5 }
 0x335   : > { %p3734_p8 = por %p3733_p7, %p3732_p11 }
 0x336   : > { %p3730_p10 = pneg %p3729_p6 }
 0x338   : > { %p3735_p9 = pnand %p3734_p8, %p3730_p10 }
 0x33a   : > { %3738 = shalt.err (!%p3735_p9)
}
 0x33b   : > { %s3825_s1 = smov 128   ;;  %s3826_s3 = smov 8  }
 0x33c   : > { %3176 = dma.vmem_to_hbm [thread:$0]  (%p3968_p5), %s4627_s18, 8192, %s4625_s17, %s2700_s21, %s3825_s1, %s3825_s1, %s3826_s3  }
 0x33d PF: > { %s4720_s5 = sld [smem:[#allocation12_spill]]  ;;  %p3198_p2 = scmp.ge.s32.totalorder %s3813_s25, 2 }
 0x33e   : > { %s4721_s22 = sld [smem:[#allocation14_spill]] }
 0x343   : > { %s2731_s16 = sand.u32 1, %s4720_s5  }
 0x344   : > { %p4722_p12 = scmp.ne.s32.totalorder %s4721_s22, 0  ;;  %s2732_s28 = scalar_lea.sflag [#allocation4], %s2731_s16 }
 0x346   : > { %p3190_p13 = pnand %p3198_p2, %p4722_p12 }
 0x348   : > { %p3191_p3 = pneg %p3190_p13 }
 0x34a   : > { %3780 = dma.done.wait (%p3191_p3), %s2732_s28, 8192  }
 0x34b   : > { %3782 = vsyncadd (%p3191_p3), %s2732_s28, 4294959104  ;;  %s22_s25 = sadd.s32 1, %s3813_s25   ;;  %s4723_s6 = sld [smem:[#allocation15_spill]] }
 0x34c   : > { %p19_p0 = scmp.ge.s32.totalorder %s22_s25, 6   ;;  %s4724_s18 = smov %s3789_s19 }
 0x34d   : > { %s4725_s19 = smov %s3793_s20  ;;  %s4726_s20 = smov %s3981_s9 }
 0x34e   : > { %s4727_s21 = smov %s3805_s23  ;;  %s4728_s22 = smov %s3809_s24 }
 0x34f   : > { %s4730_s24 = smov %s4736_s11  ;;  %21 = sbr.rel (!%p19_p0) target bundleno = 12 (0xc), region = 96 }
 0x351   : > { %s4729_s23 = smov %s4723_s6 }
 0x354   :  { %2737 = vsyncpa [#allocation3], 1 }
 0x355   :  { %2739 = vsyncpa [#allocation3 + $0x1], 1 }
 0x356   :  { %2740 = vsyncpa [#allocation6], 1 }
 0x357   :  { %2741 = vsyncpa [#allocation4], 1 }
 0x358   :  { %2743 = vsyncpa [#allocation4 + $0x1], 1 }

</bundles_post_ra>
